<compile_context>
chip_gen: v6e
topology: v6e:2x2x1
jax: 0.10.0
libtpu: 0.0.40
codegen_flags: <defaults>
</compile_context>

<pallas_src>
import functools

import jax
import jax.numpy as jnp
from jax.experimental import pallas as pl
from jax.experimental.pallas import tpu as pltpu


def _round_up(x, m):
    return (x + m - 1) // m * m


# ---------------------------------------------------------------------------
# Pallas kernel (whole forward fused, one grid axis over batch blocks)
# ---------------------------------------------------------------------------
def music_vae_kernel(
    x_ref, eps_ref,                                        # activations (f32)
    w1_ref, w2_ref, wmv_ref, wzf_ref, wd2_ref, wout_ref,   # packed weights (bf16)
    b_ref,                                                 # stacked bias/LN rows (f32)
    out_ref,                                               # (block_b, 512) f32 slab
):
    f32 = jnp.float32
    bf16 = jnp.bfloat16
    hidden = w1_ref.shape[1]
    latent = eps_ref.shape[1]
    out_pad = wout_ref.shape[1] // 2

    def brow(i, w):
        # row i of the stacked bias array, first w lanes -> (1, w)
        return b_ref[i:i + 1, 0:w]

    def layernorm(h, gamma, beta, ln_eps=1e-5):
        # torch.nn.LayerNorm: biased variance, eps=1e-5, over last dim.
        # One-pass variance: the two reductions are independent (shorter
        # serial chain than mean -> (h - mean) -> mean of squares).
        mean = jnp.mean(h, axis=-1, keepdims=True)
        meansq = jnp.mean(h * h, axis=-1, keepdims=True)
        var = jnp.maximum(meansq - mean * mean, 0.0)
        return (h - mean) * jax.lax.rsqrt(var + ln_eps) * gamma + beta

    def lin(h, w_ref, b_i, width):
        # bf16 MXU matmul with f32 accumulate, f32 bias add.
        return (jnp.dot(h.astype(bf16), w_ref[...],
                        preferred_element_type=f32) + brow(b_i, width))

    def lin_ln_relu(h, w_ref, b_i, g_i, bt_i, width):
        hh = lin(h, w_ref, b_i, width)
        return jnp.maximum(layernorm(hh, brow(g_i, width), brow(bt_i, width)), 0.0)

    x = x_ref[...]                       # f32
    eps = eps_ref[...].astype(f32)

    # ---------------- encoder (Dropout = identity) ----------------
    h = lin_ln_relu(x, w1_ref, 0, 1, 2, hidden)
    h = lin_ln_relu(h, w2_ref, 3, 4, 5, hidden)

    # ---------------- fused mu / log_var heads ----------------
    mv = lin(h, wmv_ref, 6, 2 * latent)
    mu = mv[:, 0:latent]
    log_var = mv[:, latent:2 * latent]

    # ---------------- reparameterize (f32) ----------------
    z = mu + eps * jnp.exp(0.5 * log_var)

    # ---------- fused decoder-layer-1 + genre-layer-1 (both eat z) ----------
    dg = lin(z, wzf_ref, 7, 2 * hidden)
    d = jnp.maximum(layernorm(dg[:, 0:hidden], brow(8, hidden), brow(9, hidden)), 0.0)
    g = jnp.maximum(layernorm(dg[:, hidden:2 * hidden],
                              brow(10, hidden), brow(11, hidden)), 0.0)

    # ---------------- decoder second hidden layer ----------------
    d = lin_ln_relu(d, wd2_ref, 12, 13, 14, hidden)

    # ---------------- output heads (lane-padded to out_pad each) -----------
    wout = wout_ref[...]
    recon_pad = (jnp.dot(d.astype(bf16), wout[:, 0:out_pad],
                         preferred_element_type=f32) + brow(15, out_pad))
    genre_pad = (jnp.dot(g.astype(bf16), wout[:, out_pad:2 * out_pad],
                         preferred_element_type=f32) + brow(16, out_pad))

    # lane-dense slab: [recon_pad | mu | log_var | genre_pad]
    # All offsets are multiples of 128 lanes -> three unmasked vst stores.
    out_ref[:, 0:out_pad] = recon_pad
    out_ref[:, out_pad:out_pad + 2 * latent] = mv
    out_ref[:, out_pad + 2 * latent:2 * out_pad + 2 * latent] = genre_pad


# ---------------------------------------------------------------------------
# Parameter construction (xavier_normal like torch init) and packing
# ---------------------------------------------------------------------------
def _xavier_normal(key, fan_in, fan_out):
    std = (2.0 / (fan_in + fan_out)) ** 0.5
    return std * jax.random.normal(key, (fan_in, fan_out), dtype=jnp.float32)


def make_params(key, input_dim, hidden_dim, latent_dim, num_genres):
    keys = jax.random.split(key, 16)
    k = iter(keys)

    def lin(fan_in, fan_out):
        return (_xavier_normal(next(k), fan_in, fan_out),
                jnp.zeros((1, fan_out), jnp.float32))

    def ln(dim):
        return jnp.ones((1, dim), jnp.float32), jnp.zeros((1, dim), jnp.float32)

    p = {}
    p["ew1"], p["eb1"] = lin(input_dim, hidden_dim)
    p["eg1"], p["ebt1"] = ln(hidden_dim)
    p["ew2"], p["eb2"] = lin(hidden_dim, hidden_dim)
    p["eg2"], p["ebt2"] = ln(hidden_dim)
    p["wmu"], p["bmu"] = lin(hidden_dim, latent_dim)
    p["wvar"], p["bvar"] = lin(hidden_dim, latent_dim)
    p["dw1"], p["db1"] = lin(latent_dim, hidden_dim)
    p["dg1"], p["dbt1"] = ln(hidden_dim)
    p["dw2"], p["db2"] = lin(hidden_dim, hidden_dim)
    p["dg2"], p["dbt2"] = ln(hidden_dim)
    p["dw3"], p["db3"] = lin(hidden_dim, input_dim)
    p["gw1"], p["gb1"] = lin(latent_dim, hidden_dim)
    p["gg1"], p["gbt1"] = ln(hidden_dim)
    p["gw2"], p["gb2"] = lin(hidden_dim, num_genres)
    return p


def pack_params(p, input_dim, hidden_dim, latent_dim, num_genres):
    """Pack/pad params into few, lane-aligned kernel operands (weights bf16)."""
    k_pad = _round_up(input_dim, 16)                      # sublane-align first K (bf16)
    out_pad = _round_up(max(input_dim, num_genres), 128)  # lane-dense output heads
    bias_w = max(2 * hidden_dim, 2 * latent_dim, out_pad)

    def pad_cols(a, w):
        return jnp.pad(a, ((0, 0), (0, w - a.shape[1])))

    def bf(a):
        return a.astype(jnp.bfloat16)

    w_enc1 = bf(jnp.pad(p["ew1"], ((0, k_pad - input_dim), (0, 0))))
    w_enc2 = bf(p["ew2"])
    w_mv = bf(jnp.concatenate([p["wmu"], p["wvar"]], axis=1))         # [H, 2L]
    w_zf = bf(jnp.concatenate([p["dw1"], p["gw1"]], axis=1))          # [L, 2H]
    w_d2 = bf(p["dw2"])
    w_out = bf(jnp.concatenate(
        [pad_cols(p["dw3"], out_pad), pad_cols(p["gw2"], out_pad)], axis=1))

    rows = [
        p["eb1"], p["eg1"], p["ebt1"],                            # 0..2
        p["eb2"], p["eg2"], p["ebt2"],                            # 3..5
        jnp.concatenate([p["bmu"], p["bvar"]], axis=1),           # 6
        jnp.concatenate([p["db1"], p["gb1"]], axis=1),            # 7
        p["dg1"], p["dbt1"],                                      # 8, 9
        p["gg1"], p["gbt1"],                                      # 10, 11
        p["db2"], p["dg2"], p["dbt2"],                            # 12..14
        pad_cols(p["db3"], out_pad),                              # 15
        pad_cols(p["gb2"], out_pad),                              # 16
    ]
    biases = jnp.concatenate([pad_cols(r, bias_w) for r in rows], axis=0)
    return (w_enc1, w_enc2, w_mv, w_zf, w_d2, w_out, biases)


# ---------------------------------------------------------------------------
# Wrapper
# ---------------------------------------------------------------------------
@functools.partial(jax.jit, static_argnames=("input_dim", "latent_dim", "num_genres"))
def music_vae_forward(x, eps, packed, *, input_dim, latent_dim, num_genres):
    w_enc1, w_enc2, w_mv, w_zf, w_d2, w_out, biases = packed
    batch = x.shape[0]
    k_pad = w_enc1.shape[0]
    out_pad = w_out.shape[1] // 2
    out_w = 2 * out_pad + 2 * latent_dim

    device_kind = jax.devices()[0].device_kind.lower()
    # v6e/v7x MXU is 256 rows tall -> bigger batch blocks; v5e keeps 128.
    big_block = 128 if "v5" in device_kind else 256

    # Batch tiling: one block for small batches (padded to a multiple of 16
    # for bf16 sublane packing), big_block-row blocks for large ones.
    if batch <= big_block:
        block_b = _round_up(batch, 16)
        b_pad = block_b
    else:
        block_b = big_block
        b_pad = _round_up(batch, block_b)
    grid = (b_pad // block_b,)

    if grid[0] == 1:
        semantics = ("arbitrary",)
    elif "v7" in device_kind:
        # Only CORE_PARALLEL actually shards the grid across v7x's 2 TCs.
        semantics = (pltpu.CORE_PARALLEL,)
    else:
        semantics = ("parallel",)

    x_p = jnp.pad(x.astype(jnp.float32),
                  ((0, b_pad - batch), (0, k_pad - input_dim)))
    eps_p = jnp.pad(eps.astype(jnp.float32), ((0, b_pad - batch), (0, 0)))

    def batch_spec(width):
        return pl.BlockSpec((block_b, width), lambda i: (i, 0))

    def const_spec():
        # grid-invariant operand: whole array resident in VMEM, single copy,
        # no per-grid-step double buffering / DMA bookkeeping.
        return pl.BlockSpec(memory_space=pltpu.MemorySpace.VMEM)

    slab = pl.pallas_call(
        music_vae_kernel,
        out_shape=jax.ShapeDtypeStruct((b_pad, out_w), jnp.float32),
        grid=grid,
        in_specs=[
            batch_spec(k_pad),
            batch_spec(latent_dim),
            const_spec(), const_spec(), const_spec(),
            const_spec(), const_spec(), const_spec(),
            const_spec(),
        ],
        out_specs=batch_spec(out_w),
        compiler_params=pltpu.CompilerParams(dimension_semantics=semantics),
    )(x_p, eps_p, w_enc1, w_enc2, w_mv, w_zf, w_d2, w_out, biases)

    recon = slab[:batch, 0:input_dim]
    mu = slab[:batch, out_pad:out_pad + latent_dim]
    log_var = slab[:batch, out_pad + latent_dim:out_pad + 2 * latent_dim]
    genre = slab[:batch,
                 out_pad + 2 * latent_dim:out_pad + 2 * latent_dim + num_genres]
    return recon, mu, log_var, genre


# ---------------------------------------------------------------------------
# Pure-JAX f32 reference (for sanity checking the fused kernel)
# ---------------------------------------------------------------------------
def reference_forward(x, eps, p):
    def ln(h, g, b):
        m = h.mean(-1, keepdims=True)
        v = ((h - m) ** 2).mean(-1, keepdims=True)
        return (h - m) * jax.lax.rsqrt(v + 1e-5) * g + b

    h = jnp.maximum(ln(x @ p["ew1"] + p["eb1"], p["eg1"], p["ebt1"]), 0.0)
    h = jnp.maximum(ln(h @ p["ew2"] + p["eb2"], p["eg2"], p["ebt2"]), 0.0)
    mu = h @ p["wmu"] + p["bmu"]
    lv = h @ p["wvar"] + p["bvar"]
    z = mu + eps * jnp.exp(0.5 * lv)
    d = jnp.maximum(ln(z @ p["dw1"] + p["db1"], p["dg1"], p["dbt1"]), 0.0)
    d = jnp.maximum(ln(d @ p["dw2"] + p["db2"], p["dg2"], p["dbt2"]), 0.0)
    recon = d @ p["dw3"] + p["db3"]
    g = jnp.maximum(ln(z @ p["gw1"] + p["gb1"], p["gg1"], p["gbt1"]), 0.0)
    genre = g @ p["gw2"] + p["gb2"]
    return recon, mu, lv, genre


# ---------------------------------------------------------------------------
# Main
# ---------------------------------------------------------------------------
if __name__ == "__main__":
    # Small-but-representative sizes (constructor args of MusicVAE).
    INPUT_DIM = 29
    HIDDEN_DIM = 256
    LATENT_DIM = 128
    NUM_GENRES = 13
    BATCH = 8     # NOTE: M=8 starves MXU rows; batch >=128/256 for throughput.

    root = jax.random.PRNGKey(0)
    k_params, k_x, k_eps = jax.random.split(root, 3)

    params = make_params(k_params, INPUT_DIM, HIDDEN_DIM, LATENT_DIM, NUM_GENRES)
    packed = pack_params(params, INPUT_DIM, HIDDEN_DIM, LATENT_DIM, NUM_GENRES)

    x = jax.random.normal(k_x, (BATCH, INPUT_DIM), dtype=jnp.float32)
    eps = jax.random.normal(k_eps, (BATCH, LATENT_DIM), dtype=jnp.float32)

    recon, mu, log_var, genre_pred = music_vae_forward(
        x, eps, packed,
        input_dim=INPUT_DIM, latent_dim=LATENT_DIM, num_genres=NUM_GENRES,
    )
    jax.block_until_ready((recon, mu, log_var, genre_pred))

    assert recon.shape == (BATCH, INPUT_DIM)
    assert mu.shape == (BATCH, LATENT_DIM)
    assert log_var.shape == (BATCH, LATENT_DIM)
    assert genre_pred.shape == (BATCH, NUM_GENRES)
    assert all(bool(jnp.all(jnp.isfinite(a)))
               for a in (recon, mu, log_var, genre_pred))

    # Tolerance reflects bf16 MXU inputs (weights + activations rounded to
    # bf16 before each matmul, f32 accumulation) vs. the full-f32 reference.
    r_ref, mu_ref2, lv_ref2, g_ref2 = reference_forward(x, eps, params)
    for got, want in ((recon, r_ref), (mu, mu_ref2),
                      (log_var, lv_ref2), (genre_pred, g_ref2)):
        scale = max(1.0, float(jnp.max(jnp.abs(want))))
        assert float(jnp.max(jnp.abs(got - want))) < 5e-2 * scale

    print("KERNEL_OK")
</pallas_src>

<mosaic_0001>
module attributes {stable_mosaic.version = 11 : i64} {
  func.func @music_vae_kernel(%arg0: i32, %arg1: memref<16x32xf32, #tpu.memory_space<vmem>>, %arg2: memref<16x128xf32, #tpu.memory_space<vmem>>, %arg3: memref<32x256xbf16, #tpu.memory_space<vmem>>, %arg4: memref<256x256xbf16, #tpu.memory_space<vmem>>, %arg5: memref<256x256xbf16, #tpu.memory_space<vmem>>, %arg6: memref<128x512xbf16, #tpu.memory_space<vmem>>, %arg7: memref<256x256xbf16, #tpu.memory_space<vmem>>, %arg8: memref<256x256xbf16, #tpu.memory_space<vmem>>, %arg9: memref<17x512xf32, #tpu.memory_space<vmem>>, %arg10: memref<16x512xf32, #tpu.memory_space<vmem>>) attributes {dimension_semantics = [#tpu.dimension_semantics<arbitrary>], iteration_bounds = array<i64: 1>, scalar_prefetch = 0 : i64, scratch_operands = 0 : i64, tpu.core_type = #tpu.core_type<tc>, window_params = [{transform_indices = @transform_0, window_bounds = array<i64: 16, 32>}, {transform_indices = @transform_1, window_bounds = array<i64: 16, 128>}, {pipeline_mode = #tpu.pipeline_mode<synchronous>, transform_indices = @transform_2, window_bounds = array<i64: 32, 256>}, {pipeline_mode = #tpu.pipeline_mode<synchronous>, transform_indices = @transform_3, window_bounds = array<i64: 256, 256>}, {pipeline_mode = #tpu.pipeline_mode<synchronous>, transform_indices = @transform_4, window_bounds = array<i64: 256, 256>}, {pipeline_mode = #tpu.pipeline_mode<synchronous>, transform_indices = @transform_5, window_bounds = array<i64: 128, 512>}, {pipeline_mode = #tpu.pipeline_mode<synchronous>, transform_indices = @transform_6, window_bounds = array<i64: 256, 256>}, {pipeline_mode = #tpu.pipeline_mode<synchronous>, transform_indices = @transform_7, window_bounds = array<i64: 256, 256>}, {pipeline_mode = #tpu.pipeline_mode<synchronous>, transform_indices = @transform_8, window_bounds = array<i64: 17, 512>}, {transform_indices = @transform_9, window_bounds = array<i64: 16, 512>}]} {
    %c0 = arith.constant 0 : index
    %c0_0 = arith.constant 0 : index
    %0 = vector.load %arg1[%c0, %c0_0] : memref<16x32xf32, #tpu.memory_space<vmem>>, vector<16x32xf32>
    %c0_1 = arith.constant 0 : index
    %c0_2 = arith.constant 0 : index
    %1 = vector.load %arg2[%c0_1, %c0_2] : memref<16x128xf32, #tpu.memory_space<vmem>>, vector<16x128xf32>
    %2 = arith.truncf %0 : vector<16x32xf32> to vector<16x32xbf16>
    %c0_3 = arith.constant 0 : index
    %c0_4 = arith.constant 0 : index
    %3 = vector.load %arg3[%c0_3, %c0_4] : memref<32x256xbf16, #tpu.memory_space<vmem>>, vector<32x256xbf16>
    %cst = arith.constant dense<0.000000e+00> : vector<16x256xf32>
    %4 = tpu.matmul %2, %3, %cst {dimension_numbers = #tpu.dot_dimension_numbers<[1], [0], [0], [1], [0, 0, 1, 1], [], []>} : vector<16x32xbf16>, vector<32x256xbf16>, vector<16x256xf32> -> vector<16x256xf32>
    %c0_5 = arith.constant 0 : index
    %c0_6 = arith.constant 0 : index
    %5 = vector.load %arg9[%c0_5, %c0_6] : memref<17x512xf32, #tpu.memory_space<vmem>>, vector<1x256xf32>
    %6 = vector.broadcast %5 : vector<1x256xf32> to vector<16x256xf32>
    %7 = arith.addf %4, %6 : vector<16x256xf32>
    %c1 = arith.constant 1 : index
    %c0_7 = arith.constant 0 : index
    %8 = vector.load %arg9[%c1, %c0_7] : memref<17x512xf32, #tpu.memory_space<vmem>>, vector<1x256xf32>
    %c2 = arith.constant 2 : index
    %c0_8 = arith.constant 0 : index
    %9 = vector.load %arg9[%c2, %c0_8] : memref<17x512xf32, #tpu.memory_space<vmem>>, vector<1x256xf32>
    %cst_9 = arith.constant dense<0.000000e+00> : vector<16xf32>
    %10 = vector.multi_reduction <add>, %7, %cst_9 [1] : vector<16x256xf32> to vector<16xf32>
    %11 = vector.shape_cast %10 : vector<16xf32> to vector<16x1xf32>
    %cst_10 = arith.constant 2.560000e+02 : f32
    %12 = vector.broadcast %cst_10 : f32 to vector<16x1xf32>
    %13 = arith.divf %11, %12 : vector<16x1xf32>
    %14 = arith.mulf %7, %7 : vector<16x256xf32>
    %cst_11 = arith.constant dense<0.000000e+00> : vector<16xf32>
    %15 = vector.multi_reduction <add>, %14, %cst_11 [1] : vector<16x256xf32> to vector<16xf32>
    %16 = vector.shape_cast %15 : vector<16xf32> to vector<16x1xf32>
    %cst_12 = arith.constant 2.560000e+02 : f32
    %17 = vector.broadcast %cst_12 : f32 to vector<16x1xf32>
    %18 = arith.divf %16, %17 : vector<16x1xf32>
    %19 = arith.mulf %13, %13 : vector<16x1xf32>
    %20 = arith.subf %18, %19 : vector<16x1xf32>
    %cst_13 = arith.constant 0.000000e+00 : f32
    %21 = vector.broadcast %cst_13 : f32 to vector<16x1xf32>
    %22 = arith.maximumf %20, %21 : vector<16x1xf32>
    %23 = vector.broadcast %13 : vector<16x1xf32> to vector<16x256xf32>
    %24 = arith.subf %7, %23 : vector<16x256xf32>
    %cst_14 = arith.constant 9.99999974E-6 : f32
    %25 = vector.broadcast %cst_14 : f32 to vector<16x1xf32>
    %26 = arith.addf %22, %25 : vector<16x1xf32>
    %27 = math.rsqrt %26 : vector<16x1xf32>
    %28 = vector.broadcast %27 : vector<16x1xf32> to vector<16x256xf32>
    %29 = arith.mulf %24, %28 : vector<16x256xf32>
    %30 = vector.broadcast %8 : vector<1x256xf32> to vector<16x256xf32>
    %31 = arith.mulf %29, %30 : vector<16x256xf32>
    %32 = vector.broadcast %9 : vector<1x256xf32> to vector<16x256xf32>
    %33 = arith.addf %31, %32 : vector<16x256xf32>
    %cst_15 = arith.constant 0.000000e+00 : f32
    %34 = vector.broadcast %cst_15 : f32 to vector<16x256xf32>
    %35 = arith.maximumf %33, %34 : vector<16x256xf32>
    %36 = arith.truncf %35 : vector<16x256xf32> to vector<16x256xbf16>
    %c0_16 = arith.constant 0 : index
    %c0_17 = arith.constant 0 : index
    %37 = vector.load %arg4[%c0_16, %c0_17] : memref<256x256xbf16, #tpu.memory_space<vmem>>, vector<256x256xbf16>
    %cst_18 = arith.constant dense<0.000000e+00> : vector<16x256xf32>
    %38 = tpu.matmul %36, %37, %cst_18 {dimension_numbers = #tpu.dot_dimension_numbers<[1], [0], [0], [1], [0, 0, 1, 1], [], []>} : vector<16x256xbf16>, vector<256x256xbf16>, vector<16x256xf32> -> vector<16x256xf32>
    %c3 = arith.constant 3 : index
    %c0_19 = arith.constant 0 : index
    %39 = vector.load %arg9[%c3, %c0_19] : memref<17x512xf32, #tpu.memory_space<vmem>>, vector<1x256xf32>
    %40 = vector.broadcast %39 : vector<1x256xf32> to vector<16x256xf32>
    %41 = arith.addf %38, %40 : vector<16x256xf32>
    %c4 = arith.constant 4 : index
    %c0_20 = arith.constant 0 : index
    %42 = vector.load %arg9[%c4, %c0_20] : memref<17x512xf32, #tpu.memory_space<vmem>>, vector<1x256xf32>
    %c5 = arith.constant 5 : index
    %c0_21 = arith.constant 0 : index
    %43 = vector.load %arg9[%c5, %c0_21] : memref<17x512xf32, #tpu.memory_space<vmem>>, vector<1x256xf32>
    %cst_22 = arith.constant dense<0.000000e+00> : vector<16xf32>
    %44 = vector.multi_reduction <add>, %41, %cst_22 [1] : vector<16x256xf32> to vector<16xf32>
    %45 = vector.shape_cast %44 : vector<16xf32> to vector<16x1xf32>
    %cst_23 = arith.constant 2.560000e+02 : f32
    %46 = vector.broadcast %cst_23 : f32 to vector<16x1xf32>
    %47 = arith.divf %45, %46 : vector<16x1xf32>
    %48 = arith.mulf %41, %41 : vector<16x256xf32>
    %cst_24 = arith.constant dense<0.000000e+00> : vector<16xf32>
    %49 = vector.multi_reduction <add>, %48, %cst_24 [1] : vector<16x256xf32> to vector<16xf32>
    %50 = vector.shape_cast %49 : vector<16xf32> to vector<16x1xf32>
    %cst_25 = arith.constant 2.560000e+02 : f32
    %51 = vector.broadcast %cst_25 : f32 to vector<16x1xf32>
    %52 = arith.divf %50, %51 : vector<16x1xf32>
    %53 = arith.mulf %47, %47 : vector<16x1xf32>
    %54 = arith.subf %52, %53 : vector<16x1xf32>
    %cst_26 = arith.constant 0.000000e+00 : f32
    %55 = vector.broadcast %cst_26 : f32 to vector<16x1xf32>
    %56 = arith.maximumf %54, %55 : vector<16x1xf32>
    %57 = vector.broadcast %47 : vector<16x1xf32> to vector<16x256xf32>
    %58 = arith.subf %41, %57 : vector<16x256xf32>
    %cst_27 = arith.constant 9.99999974E-6 : f32
    %59 = vector.broadcast %cst_27 : f32 to vector<16x1xf32>
    %60 = arith.addf %56, %59 : vector<16x1xf32>
    %61 = math.rsqrt %60 : vector<16x1xf32>
    %62 = vector.broadcast %61 : vector<16x1xf32> to vector<16x256xf32>
    %63 = arith.mulf %58, %62 : vector<16x256xf32>
    %64 = vector.broadcast %42 : vector<1x256xf32> to vector<16x256xf32>
    %65 = arith.mulf %63, %64 : vector<16x256xf32>
    %66 = vector.broadcast %43 : vector<1x256xf32> to vector<16x256xf32>
    %67 = arith.addf %65, %66 : vector<16x256xf32>
    %cst_28 = arith.constant 0.000000e+00 : f32
    %68 = vector.broadcast %cst_28 : f32 to vector<16x256xf32>
    %69 = arith.maximumf %67, %68 : vector<16x256xf32>
    %70 = arith.truncf %69 : vector<16x256xf32> to vector<16x256xbf16>
    %c0_29 = arith.constant 0 : index
    %c0_30 = arith.constant 0 : index
    %71 = vector.load %arg5[%c0_29, %c0_30] : memref<256x256xbf16, #tpu.memory_space<vmem>>, vector<256x256xbf16>
    %cst_31 = arith.constant dense<0.000000e+00> : vector<16x256xf32>
    %72 = tpu.matmul %70, %71, %cst_31 {dimension_numbers = #tpu.dot_dimension_numbers<[1], [0], [0], [1], [0, 0, 1, 1], [], []>} : vector<16x256xbf16>, vector<256x256xbf16>, vector<16x256xf32> -> vector<16x256xf32>
    %c6 = arith.constant 6 : index
    %c0_32 = arith.constant 0 : index
    %73 = vector.load %arg9[%c6, %c0_32] : memref<17x512xf32, #tpu.memory_space<vmem>>, vector<1x256xf32>
    %74 = vector.broadcast %73 : vector<1x256xf32> to vector<16x256xf32>
    %75 = arith.addf %72, %74 : vector<16x256xf32>
    %76 = vector.extract_strided_slice %75 {offsets = [0, 0], sizes = [16, 128], strides = [1, 1]} : vector<16x256xf32> to vector<16x128xf32>
    %77 = vector.extract_strided_slice %75 {offsets = [0, 128], sizes = [16, 128], strides = [1, 1]} : vector<16x256xf32> to vector<16x128xf32>
    %cst_33 = arith.constant 5.000000e-01 : f32
    %78 = vector.broadcast %cst_33 : f32 to vector<16x128xf32>
    %79 = arith.mulf %78, %77 : vector<16x128xf32>
    %80 = math.exp %79 : vector<16x128xf32>
    %81 = arith.mulf %1, %80 : vector<16x128xf32>
    %82 = arith.addf %76, %81 : vector<16x128xf32>
    %83 = arith.truncf %82 : vector<16x128xf32> to vector<16x128xbf16>
    %c0_34 = arith.constant 0 : index
    %c0_35 = arith.constant 0 : index
    %84 = vector.load %arg6[%c0_34, %c0_35] : memref<128x512xbf16, #tpu.memory_space<vmem>>, vector<128x512xbf16>
    %cst_36 = arith.constant dense<0.000000e+00> : vector<16x512xf32>
    %85 = tpu.matmul %83, %84, %cst_36 {dimension_numbers = #tpu.dot_dimension_numbers<[1], [0], [0], [1], [0, 0, 1, 1], [], []>} : vector<16x128xbf16>, vector<128x512xbf16>, vector<16x512xf32> -> vector<16x512xf32>
    %c7 = arith.constant 7 : index
    %c0_37 = arith.constant 0 : index
    %86 = vector.load %arg9[%c7, %c0_37] : memref<17x512xf32, #tpu.memory_space<vmem>>, vector<1x512xf32>
    %87 = vector.broadcast %86 : vector<1x512xf32> to vector<16x512xf32>
    %88 = arith.addf %85, %87 : vector<16x512xf32>
    %89 = vector.extract_strided_slice %88 {offsets = [0, 0], sizes = [16, 256], strides = [1, 1]} : vector<16x512xf32> to vector<16x256xf32>
    %c8 = arith.constant 8 : index
    %c0_38 = arith.constant 0 : index
    %90 = vector.load %arg9[%c8, %c0_38] : memref<17x512xf32, #tpu.memory_space<vmem>>, vector<1x256xf32>
    %c9 = arith.constant 9 : index
    %c0_39 = arith.constant 0 : index
    %91 = vector.load %arg9[%c9, %c0_39] : memref<17x512xf32, #tpu.memory_space<vmem>>, vector<1x256xf32>
    %cst_40 = arith.constant dense<0.000000e+00> : vector<16xf32>
    %92 = vector.multi_reduction <add>, %89, %cst_40 [1] : vector<16x256xf32> to vector<16xf32>
    %93 = vector.shape_cast %92 : vector<16xf32> to vector<16x1xf32>
    %cst_41 = arith.constant 2.560000e+02 : f32
    %94 = vector.broadcast %cst_41 : f32 to vector<16x1xf32>
    %95 = arith.divf %93, %94 : vector<16x1xf32>
    %96 = arith.mulf %89, %89 : vector<16x256xf32>
    %cst_42 = arith.constant dense<0.000000e+00> : vector<16xf32>
    %97 = vector.multi_reduction <add>, %96, %cst_42 [1] : vector<16x256xf32> to vector<16xf32>
    %98 = vector.shape_cast %97 : vector<16xf32> to vector<16x1xf32>
    %cst_43 = arith.constant 2.560000e+02 : f32
    %99 = vector.broadcast %cst_43 : f32 to vector<16x1xf32>
    %100 = arith.divf %98, %99 : vector<16x1xf32>
    %101 = arith.mulf %95, %95 : vector<16x1xf32>
    %102 = arith.subf %100, %101 : vector<16x1xf32>
    %cst_44 = arith.constant 0.000000e+00 : f32
    %103 = vector.broadcast %cst_44 : f32 to vector<16x1xf32>
    %104 = arith.maximumf %102, %103 : vector<16x1xf32>
    %105 = vector.broadcast %95 : vector<16x1xf32> to vector<16x256xf32>
    %106 = arith.subf %89, %105 : vector<16x256xf32>
    %cst_45 = arith.constant 9.99999974E-6 : f32
    %107 = vector.broadcast %cst_45 : f32 to vector<16x1xf32>
    %108 = arith.addf %104, %107 : vector<16x1xf32>
    %109 = math.rsqrt %108 : vector<16x1xf32>
    %110 = vector.broadcast %109 : vector<16x1xf32> to vector<16x256xf32>
    %111 = arith.mulf %106, %110 : vector<16x256xf32>
    %112 = vector.broadcast %90 : vector<1x256xf32> to vector<16x256xf32>
    %113 = arith.mulf %111, %112 : vector<16x256xf32>
    %114 = vector.broadcast %91 : vector<1x256xf32> to vector<16x256xf32>
    %115 = arith.addf %113, %114 : vector<16x256xf32>
    %cst_46 = arith.constant 0.000000e+00 : f32
    %116 = vector.broadcast %cst_46 : f32 to vector<16x256xf32>
    %117 = arith.maximumf %115, %116 : vector<16x256xf32>
    %118 = vector.extract_strided_slice %88 {offsets = [0, 256], sizes = [16, 256], strides = [1, 1]} : vector<16x512xf32> to vector<16x256xf32>
    %c10 = arith.constant 10 : index
    %c0_47 = arith.constant 0 : index
    %119 = vector.load %arg9[%c10, %c0_47] : memref<17x512xf32, #tpu.memory_space<vmem>>, vector<1x256xf32>
    %c11 = arith.constant 11 : index
    %c0_48 = arith.constant 0 : index
    %120 = vector.load %arg9[%c11, %c0_48] : memref<17x512xf32, #tpu.memory_space<vmem>>, vector<1x256xf32>
    %cst_49 = arith.constant dense<0.000000e+00> : vector<16xf32>
    %121 = vector.multi_reduction <add>, %118, %cst_49 [1] : vector<16x256xf32> to vector<16xf32>
    %122 = vector.shape_cast %121 : vector<16xf32> to vector<16x1xf32>
    %cst_50 = arith.constant 2.560000e+02 : f32
    %123 = vector.broadcast %cst_50 : f32 to vector<16x1xf32>
    %124 = arith.divf %122, %123 : vector<16x1xf32>
    %125 = arith.mulf %118, %118 : vector<16x256xf32>
    %cst_51 = arith.constant dense<0.000000e+00> : vector<16xf32>
    %126 = vector.multi_reduction <add>, %125, %cst_51 [1] : vector<16x256xf32> to vector<16xf32>
    %127 = vector.shape_cast %126 : vector<16xf32> to vector<16x1xf32>
    %cst_52 = arith.constant 2.560000e+02 : f32
    %128 = vector.broadcast %cst_52 : f32 to vector<16x1xf32>
    %129 = arith.divf %127, %128 : vector<16x1xf32>
    %130 = arith.mulf %124, %124 : vector<16x1xf32>
    %131 = arith.subf %129, %130 : vector<16x1xf32>
    %cst_53 = arith.constant 0.000000e+00 : f32
    %132 = vector.broadcast %cst_53 : f32 to vector<16x1xf32>
    %133 = arith.maximumf %131, %132 : vector<16x1xf32>
    %134 = vector.broadcast %124 : vector<16x1xf32> to vector<16x256xf32>
    %135 = arith.subf %118, %134 : vector<16x256xf32>
    %cst_54 = arith.constant 9.99999974E-6 : f32
    %136 = vector.broadcast %cst_54 : f32 to vector<16x1xf32>
    %137 = arith.addf %133, %136 : vector<16x1xf32>
    %138 = math.rsqrt %137 : vector<16x1xf32>
    %139 = vector.broadcast %138 : vector<16x1xf32> to vector<16x256xf32>
    %140 = arith.mulf %135, %139 : vector<16x256xf32>
    %141 = vector.broadcast %119 : vector<1x256xf32> to vector<16x256xf32>
    %142 = arith.mulf %140, %141 : vector<16x256xf32>
    %143 = vector.broadcast %120 : vector<1x256xf32> to vector<16x256xf32>
    %144 = arith.addf %142, %143 : vector<16x256xf32>
    %cst_55 = arith.constant 0.000000e+00 : f32
    %145 = vector.broadcast %cst_55 : f32 to vector<16x256xf32>
    %146 = arith.maximumf %144, %145 : vector<16x256xf32>
    %147 = arith.truncf %117 : vector<16x256xf32> to vector<16x256xbf16>
    %c0_56 = arith.constant 0 : index
    %c0_57 = arith.constant 0 : index
    %148 = vector.load %arg7[%c0_56, %c0_57] : memref<256x256xbf16, #tpu.memory_space<vmem>>, vector<256x256xbf16>
    %cst_58 = arith.constant dense<0.000000e+00> : vector<16x256xf32>
    %149 = tpu.matmul %147, %148, %cst_58 {dimension_numbers = #tpu.dot_dimension_numbers<[1], [0], [0], [1], [0, 0, 1, 1], [], []>} : vector<16x256xbf16>, vector<256x256xbf16>, vector<16x256xf32> -> vector<16x256xf32>
    %c12 = arith.constant 12 : index
    %c0_59 = arith.constant 0 : index
    %150 = vector.load %arg9[%c12, %c0_59] : memref<17x512xf32, #tpu.memory_space<vmem>>, vector<1x256xf32>
    %151 = vector.broadcast %150 : vector<1x256xf32> to vector<16x256xf32>
    %152 = arith.addf %149, %151 : vector<16x256xf32>
    %c13 = arith.constant 13 : index
    %c0_60 = arith.constant 0 : index
    %153 = vector.load %arg9[%c13, %c0_60] : memref<17x512xf32, #tpu.memory_space<vmem>>, vector<1x256xf32>
    %c14 = arith.constant 14 : index
    %c0_61 = arith.constant 0 : index
    %154 = vector.load %arg9[%c14, %c0_61] : memref<17x512xf32, #tpu.memory_space<vmem>>, vector<1x256xf32>
    %cst_62 = arith.constant dense<0.000000e+00> : vector<16xf32>
    %155 = vector.multi_reduction <add>, %152, %cst_62 [1] : vector<16x256xf32> to vector<16xf32>
    %156 = vector.shape_cast %155 : vector<16xf32> to vector<16x1xf32>
    %cst_63 = arith.constant 2.560000e+02 : f32
    %157 = vector.broadcast %cst_63 : f32 to vector<16x1xf32>
    %158 = arith.divf %156, %157 : vector<16x1xf32>
    %159 = arith.mulf %152, %152 : vector<16x256xf32>
    %cst_64 = arith.constant dense<0.000000e+00> : vector<16xf32>
    %160 = vector.multi_reduction <add>, %159, %cst_64 [1] : vector<16x256xf32> to vector<16xf32>
    %161 = vector.shape_cast %160 : vector<16xf32> to vector<16x1xf32>
    %cst_65 = arith.constant 2.560000e+02 : f32
    %162 = vector.broadcast %cst_65 : f32 to vector<16x1xf32>
    %163 = arith.divf %161, %162 : vector<16x1xf32>
    %164 = arith.mulf %158, %158 : vector<16x1xf32>
    %165 = arith.subf %163, %164 : vector<16x1xf32>
    %cst_66 = arith.constant 0.000000e+00 : f32
    %166 = vector.broadcast %cst_66 : f32 to vector<16x1xf32>
    %167 = arith.maximumf %165, %166 : vector<16x1xf32>
    %168 = vector.broadcast %158 : vector<16x1xf32> to vector<16x256xf32>
    %169 = arith.subf %152, %168 : vector<16x256xf32>
    %cst_67 = arith.constant 9.99999974E-6 : f32
    %170 = vector.broadcast %cst_67 : f32 to vector<16x1xf32>
    %171 = arith.addf %167, %170 : vector<16x1xf32>
    %172 = math.rsqrt %171 : vector<16x1xf32>
    %173 = vector.broadcast %172 : vector<16x1xf32> to vector<16x256xf32>
    %174 = arith.mulf %169, %173 : vector<16x256xf32>
    %175 = vector.broadcast %153 : vector<1x256xf32> to vector<16x256xf32>
    %176 = arith.mulf %174, %175 : vector<16x256xf32>
    %177 = vector.broadcast %154 : vector<1x256xf32> to vector<16x256xf32>
    %178 = arith.addf %176, %177 : vector<16x256xf32>
    %cst_68 = arith.constant 0.000000e+00 : f32
    %179 = vector.broadcast %cst_68 : f32 to vector<16x256xf32>
    %180 = arith.maximumf %178, %179 : vector<16x256xf32>
    %c0_69 = arith.constant 0 : index
    %c0_70 = arith.constant 0 : index
    %181 = vector.load %arg8[%c0_69, %c0_70] : memref<256x256xbf16, #tpu.memory_space<vmem>>, vector<256x256xbf16>
    %182 = arith.truncf %180 : vector<16x256xf32> to vector<16x256xbf16>
    %183 = vector.extract_strided_slice %181 {offsets = [0, 0], sizes = [256, 128], strides = [1, 1]} : vector<256x256xbf16> to vector<256x128xbf16>
    %cst_71 = arith.constant dense<0.000000e+00> : vector<16x128xf32>
    %184 = tpu.matmul %182, %183, %cst_71 {dimension_numbers = #tpu.dot_dimension_numbers<[1], [0], [0], [1], [0, 0, 1, 1], [], []>} : vector<16x256xbf16>, vector<256x128xbf16>, vector<16x128xf32> -> vector<16x128xf32>
    %c15 = arith.constant 15 : index
    %c0_72 = arith.constant 0 : index
    %185 = vector.load %arg9[%c15, %c0_72] : memref<17x512xf32, #tpu.memory_space<vmem>>, vector<1x128xf32>
    %186 = vector.broadcast %185 : vector<1x128xf32> to vector<16x128xf32>
    %187 = arith.addf %184, %186 : vector<16x128xf32>
    %188 = arith.truncf %146 : vector<16x256xf32> to vector<16x256xbf16>
    %189 = vector.extract_strided_slice %181 {offsets = [0, 128], sizes = [256, 128], strides = [1, 1]} : vector<256x256xbf16> to vector<256x128xbf16>
    %cst_73 = arith.constant dense<0.000000e+00> : vector<16x128xf32>
    %190 = tpu.matmul %188, %189, %cst_73 {dimension_numbers = #tpu.dot_dimension_numbers<[1], [0], [0], [1], [0, 0, 1, 1], [], []>} : vector<16x256xbf16>, vector<256x128xbf16>, vector<16x128xf32> -> vector<16x128xf32>
    %c16 = arith.constant 16 : index
    %c0_74 = arith.constant 0 : index
    %191 = vector.load %arg9[%c16, %c0_74] : memref<17x512xf32, #tpu.memory_space<vmem>>, vector<1x128xf32>
    %192 = vector.broadcast %191 : vector<1x128xf32> to vector<16x128xf32>
    %193 = arith.addf %190, %192 : vector<16x128xf32>
    %c0_75 = arith.constant 0 : index
    %c0_76 = arith.constant 0 : index
    %194 = vector.load %arg10[%c0_75, %c0_76] : memref<16x512xf32, #tpu.memory_space<vmem>>, vector<16x128xf32>
    tpu.vector_store %arg10[%c0_75, %c0_76], %187 {strides = array<i32>} : memref<16x512xf32, #tpu.memory_space<vmem>>, vector<16x128xf32>,
    %c0_77 = arith.constant 0 : index
    %c128 = arith.constant 128 : index
    %195 = vector.load %arg10[%c0_77, %c128] : memref<16x512xf32, #tpu.memory_space<vmem>>, vector<16x256xf32>
    tpu.vector_store %arg10[%c0_77, %c128], %75 {strides = array<i32>} : memref<16x512xf32, #tpu.memory_space<vmem>>, vector<16x256xf32>,
    %c0_78 = arith.constant 0 : index
    %c384 = arith.constant 384 : index
    %196 = vector.load %arg10[%c0_78, %c384] : memref<16x512xf32, #tpu.memory_space<vmem>>, vector<16x128xf32>
    tpu.vector_store %arg10[%c0_78, %c384], %193 {strides = array<i32>} : memref<16x512xf32, #tpu.memory_space<vmem>>, vector<16x128xf32>,
    return
  }
  func.func @transform_0(%arg0: i32) -> (i32, i32) {
    %c0_i32 = arith.constant 0 : i32
    %c0_i32_0 = arith.constant 0 : i32
    return %arg0, %c0_i32 : i32, i32
  }
  func.func @transform_1(%arg0: i32) -> (i32, i32) {
    %c0_i32 = arith.constant 0 : i32
    %c0_i32_0 = arith.constant 0 : i32
    return %arg0, %c0_i32 : i32, i32
  }
  func.func @transform_2(%arg0: i32) -> (i32, i32) {
    %c0_i32 = arith.constant 0 : i32
    %c0_i32_0 = arith.constant 0 : i32
    %c0_i32_1 = arith.constant 0 : i32
    return %c0_i32, %c0_i32_0 : i32, i32
  }
  func.func @transform_3(%arg0: i32) -> (i32, i32) {
    %c0_i32 = arith.constant 0 : i32
    %c0_i32_0 = arith.constant 0 : i32
    %c0_i32_1 = arith.constant 0 : i32
    return %c0_i32, %c0_i32_0 : i32, i32
  }
  func.func @transform_4(%arg0: i32) -> (i32, i32) {
    %c0_i32 = arith.constant 0 : i32
    %c0_i32_0 = arith.constant 0 : i32
    %c0_i32_1 = arith.constant 0 : i32
    return %c0_i32, %c0_i32_0 : i32, i32
  }
  func.func @transform_5(%arg0: i32) -> (i32, i32) {
    %c0_i32 = arith.constant 0 : i32
    %c0_i32_0 = arith.constant 0 : i32
    %c0_i32_1 = arith.constant 0 : i32
    return %c0_i32, %c0_i32_0 : i32, i32
  }
  func.func @transform_6(%arg0: i32) -> (i32, i32) {
    %c0_i32 = arith.constant 0 : i32
    %c0_i32_0 = arith.constant 0 : i32
    %c0_i32_1 = arith.constant 0 : i32
    return %c0_i32, %c0_i32_0 : i32, i32
  }
  func.func @transform_7(%arg0: i32) -> (i32, i32) {
    %c0_i32 = arith.constant 0 : i32
    %c0_i32_0 = arith.constant 0 : i32
    %c0_i32_1 = arith.constant 0 : i32
    return %c0_i32, %c0_i32_0 : i32, i32
  }
  func.func @transform_8(%arg0: i32) -> (i32, i32) {
    %c0_i32 = arith.constant 0 : i32
    %c0_i32_0 = arith.constant 0 : i32
    %c0_i32_1 = arith.constant 0 : i32
    return %c0_i32, %c0_i32_0 : i32, i32
  }
  func.func @transform_9(%arg0: i32) -> (i32, i32) {
    %c0_i32 = arith.constant 0 : i32
    %c0_i32_0 = arith.constant 0 : i32
    return %arg0, %c0_i32 : i32, i32
  }
}

</mosaic_0001>

<bundles_post_ra>
// kernel: music_vae_forward.1
= control target key start
LH: loop header
LB: loop body
LE: loop exit
PB: predicated region body
PF: predicated region fallthrough
CT: control target
= control target key end

     0   :  { %14 = vsyncpa [#allocation3], 0  ;;  %s2884_s0 = inlined_call_operand.vmem [shape: f32[16,32], index: 0, kind: input, shape index: {}]   ;;  %s2885_s1 = inlined_call_operand.vmem [shape: f32[16,128], index: 1, kind: input, shape index: {}]   ;;  %s2886_s2 = inlined_call_operand.vmem [shape: bf16[32,256], index: 2, kind: input, shape index: {}]   ;;  %s2887_s3 = inlined_call_operand.hbm [shape: bf16[256,256], index: 3, kind: input, shape index: {}]   ;;  %s2888_s4 = inlined_call_operand.hbm [shape: bf16[256,256], index: 4, kind: input, shape index: {}]   ;;  %s2889_s5 = inlined_call_operand.hbm [shape: bf16[128,512], index: 5, kind: input, shape index: {}]   ;;  %s2890_s6 = inlined_call_operand.hbm [shape: bf16[256,256], index: 6, kind: input, shape index: {}]   ;;  %s2891_s7 = inlined_call_operand.hbm [shape: bf16[256,256], index: 7, kind: input, shape index: {}]   ;;  %s2892_s8 = inlined_call_operand.hbm [shape: f32[17,512], index: 8, kind: input, shape index: {}]   ;;  %s2893_s9 = inlined_call_operand.vmem [shape: f32[16,512], index: 9, kind: output, shape index: {}]  }
   0x1   :  { %15 = vsyncpa [#allocation5], 0 }
   0x2   :  { %16 = vsyncpa [#allocation8], 0 }
   0x3   :  { %17 = vsyncpa [#allocation11], 0  ;;  %s2562_s30 = smov [#allocation4]   ;;  %s2563_s11 = smov [#allocation7]  }
   0x4   :  { %s41_s10 = sshll.u32 %s2562_s30, 4  ;;  %s65_s12 = sshll.u32 %s2563_s11, 4  ;;  %s42_s10 = int_to_ptr.vmem [resolvable:$true] %s41_s10  ;;  %s66_s12 = int_to_ptr.vmem [resolvable:$true] %s65_s12 }
   0x5   :  { %s2442_s13 = scalar_lea.vmem %s42_s10, 4096  ;;  %p2447_p1 = scmp.lt.s32.totalorder %s42_s10, %s42_s10 }
   0x6   :  { %p2443_p0 = scmp.ne.s32.totalorder %s42_s10, %s2442_s13  ;;  %p2448_p2 = scmp.lt.s32.totalorder %s2442_s13, %s2442_s13 }
   0x8   :  { %p2449_p3 = por %p2448_p2, %p2447_p1 }
   0xa   :  { %p2450_p4 = pnand %p2449_p3, %p2443_p0 }
   0xc   :  { %2453 = shalt.err (!%p2450_p4)
}
   0xd   :  { %s2564_s14 = smov 128   ;;  %s2565_s15 = smov 8  }
   0xe   :  { %47 = dma.hbm_to_vmem [thread:$0]  %s2888_s4, 4096, %s42_s10, [#allocation5], %s2564_s14, %s2564_s14, %s2565_s15  }
   0xf   :  { %s2462_s18 = scalar_lea.vmem %s66_s12, 4096  ;;  %p2467_p6 = scmp.lt.s32.totalorder %s66_s12, %s66_s12 }
  0x10   :  { %p2463_p5 = scmp.ne.s32.totalorder %s66_s12, %s2462_s18  ;;  %p2468_p7 = scmp.lt.s32.totalorder %s2462_s18, %s2462_s18 }
  0x12   :  { %p2469_p8 = por %p2468_p7, %p2467_p6 }
  0x14   :  { %p2470_p9 = pnand %p2469_p8, %p2463_p5 }
  0x16   :  { %2473 = shalt.err (!%p2470_p9)
}
  0x17   :  { %71 = dma.hbm_to_vmem [thread:$0]  %s2890_s6, 4096, %s66_s12, [#allocation8], %s2564_s14, %s2564_s14, %s2565_s15  }
  0x18   :  { %s2566_s21 = smov [#allocation2]   ;;  %s2567_s23 = smov [#allocation6]  }
  0x19   :  { %s29_s22 = sshll.u32 %s2566_s21, 4  ;;  %s53_s24 = sshll.u32 %s2567_s23, 4  ;;  %s30_s22 = int_to_ptr.vmem [resolvable:$true] %s29_s22  ;;  %s54_s24 = int_to_ptr.vmem [resolvable:$true] %s53_s24 }
  0x1a   :  { %s2482_s4 = scalar_lea.vmem %s30_s22, 4096  ;;  %p2487_p11 = scmp.lt.s32.totalorder %s30_s22, %s30_s22 }
  0x1b   :  { %p2483_p10 = scmp.ne.s32.totalorder %s30_s22, %s2482_s4  ;;  %p2488_p12 = scmp.lt.s32.totalorder %s2482_s4, %s2482_s4 }
  0x1d   :  { %p2489_p13 = por %p2488_p12, %p2487_p11 }
  0x1f   :  { %p2490_p0 = pnand %p2489_p13, %p2483_p10 }
  0x21   :  { %2493 = shalt.err (!%p2490_p0)
}
  0x22   :  { %35 = dma.hbm_to_vmem [thread:$0]  %s2887_s3, 4096, %s30_s22, [#allocation3], %s2564_s14, %s2564_s14, %s2565_s15  }
  0x23   :  { %s2502_s6 = scalar_lea.vmem %s54_s24, 4096  ;;  %p2507_p2 = scmp.lt.s32.totalorder %s54_s24, %s54_s24 }
  0x24   :  { %p2503_p1 = scmp.ne.s32.totalorder %s54_s24, %s2502_s6  ;;  %p2508_p3 = scmp.lt.s32.totalorder %s2502_s6, %s2502_s6 }
  0x26   :  { %p2509_p4 = por %p2508_p3, %p2507_p2 }
  0x28   :  { %p2510_p5 = pnand %p2509_p4, %p2503_p1 }
  0x2a   :  { %2513 = shalt.err (!%p2510_p5)
}
  0x2b   :  { %s2568_s27 = smov 256   ;;  %s2569_s28 = smov 16  }
  0x2c   :  { %59 = dma.hbm_to_vmem [thread:$0]  %s2889_s5, 4096, %s54_s24, [#allocation5], %s2568_s27, %s2568_s27, %s2569_s28  }
  0x2d   :  { %s2570_s10 = smov [#allocation9]   ;;  %s2571_s12 = smov [#allocation10]  }
  0x2e   :  { %s77_s11 = sshll.u32 %s2570_s10, 4  ;;  %s89_s13 = sshll.u32 %s2571_s12, 4  ;;  %s78_s11 = int_to_ptr.vmem [resolvable:$true] %s77_s11  ;;  %s90_s13 = int_to_ptr.vmem [resolvable:$true] %s89_s13 }
  0x2f   :  { %s2522_s3 = scalar_lea.vmem %s78_s11, 4096  ;;  %p2527_p7 = scmp.lt.s32.totalorder %s78_s11, %s78_s11 }
  0x30   :  { %p2523_p6 = scmp.ne.s32.totalorder %s78_s11, %s2522_s3  ;;  %p2528_p8 = scmp.lt.s32.totalorder %s2522_s3, %s2522_s3 }
  0x32   :  { %p2529_p9 = por %p2528_p8, %p2527_p7 }
  0x34   :  { %p2530_p10 = pnand %p2529_p9, %p2523_p6 }
  0x36   :  { %2533 = shalt.err (!%p2530_p10)
}
  0x37   :  { %83 = dma.hbm_to_vmem [thread:$0]  %s2891_s7, 4096, %s78_s11, [#allocation8], %s2564_s14, %s2564_s14, %s2565_s15  }
  0x38   :  { %s2542_s5 = scalar_lea.vmem %s90_s13, 1536  ;;  %p2547_p12 = scmp.lt.s32.totalorder %s90_s13, %s90_s13 }
  0x39   :  { %p2543_p11 = scmp.ne.s32.totalorder %s90_s13, %s2542_s5  ;;  %p2548_p13 = scmp.lt.s32.totalorder %s2542_s5, %s2542_s5 }
  0x3b   :  { %p2549_p0 = por %p2548_p13, %p2547_p12 }
  0x3d   :  { %p2550_p1 = pnand %p2549_p0, %p2543_p11 }
  0x3f   :  { %2553 = shalt.err (!%p2550_p1)
}
  0x40   :  { %s2572_s18 = smov 512   ;;  %s2573_s19 = smov 32  }
  0x41   :  { %95 = dma.hbm_to_vmem [thread:$0]  %s2892_s8, 1536, %s90_s13, [#allocation11], %s2572_s18, %s2572_s18, %s2573_s19  }
  0x42   :  { %2554 = dma.done.wait [#allocation3], 4096  }
  0x43   :  { %2555 = vsyncadd [#allocation3], 4294963200 }
  0x44   :  { %2556 = dma.done.wait [#allocation5], 8192  }
  0x45   :  { %2557 = vsyncadd [#allocation5], 4294959104 }
  0x46   :  { %2558 = dma.done.wait [#allocation8], 8192  }
  0x47   :  { %2559 = vsyncadd [#allocation8], 4294959104 }
  0x48   :  { %2560 = dma.done.wait [#allocation11], 1536  }
  0x49   :  { %2561 = vsyncadd [#allocation11], 4294965760  ;;  %v2574_v0 = vmov 0   ;;  %v2164_v1 = vld [vmem:[%s2886_s2 + $0x14] ss:$8 sps:$4 sm:$0xff]   ;;  %v115_v5 = vld [vmem:[%s2884_s0] sm:$0xff]  ;;  %v126_v21 = vlaneseq }
  0x4a   :  { %192 = vmatprep.mubr.bf16.mxu0 %v2574_v0  ;;  %v2166_v2 = vld [vmem:[%s2886_s2 + $0x10] ss:$8 sps:$4 sm:$0xff]   ;;  %172 = vmatprep.subr.bf16.mxu0 %v2164_v1  ;;  %v2167_v3 = vld [vmem:[%s2886_s2 + $0x4] ss:$8 sps:$4 sm:$0xff]   ;;  %v2169_v4 = vld [vmem:[%s2886_s2] ss:$8 sps:$4 sm:$0xff]  }
  0x4b   :  { %173 = vmatpush1.bf16.msra.mxu0 %v2166_v2  ;;  %v116_v6 = vld [vmem:[%s2884_s0 + $0x8] sm:$0xff]  ;;  %vm156_vm0 = vcmask 261120   ;;  %v2170_v8 = vld [vmem:[#allocation2 + $0x74] ss:$8 sps:$4 sm:$0xff]   ;;  %v2172_v9 = vld [vmem:[#allocation2 + $0x70] ss:$8 sps:$4 sm:$0xff]  }
  0x4c   :  { %174 = vmatprep.subr.bf16.mxu0 %v2167_v3  ;;  %v119_v7 = vpack.c.bf16 %v116_v6, %v115_v5  ;;  %v2173_v10 = vld [vmem:[#allocation2 + $0x64] ss:$8 sps:$4 sm:$0xff]   ;;  %487 = vmatprep.subr.bf16.mxu1 %v2170_v8  ;;  %v2175_v11 = vld [vmem:[#allocation2 + $0x60] ss:$8 sps:$4 sm:$0xff]   ;;  %v2176_v12 = vld [vmem:[#allocation2 + $0x54] ss:$8 sps:$4 sm:$0xff]  }
  0x4d   :  { %488 = vmatpush1.bf16.msra.mxu1 %v2172_v9  ;;  %v2178_v13 = vld [vmem:[#allocation2 + $0x50] ss:$8 sps:$4 sm:$0xff]   ;;  %v2179_v14 = vld [vmem:[#allocation2 + $0x44] ss:$8 sps:$4 sm:$0xff]   ;;  %v2181_v15 = vld [vmem:[#allocation2 + $0x40] ss:$8 sps:$4 sm:$0xff]  }
  0x4e   :  { %489 = vmatprep.subr.bf16.mxu1 %v2173_v10  ;;  %v2182_v16 = vld [vmem:[#allocation2 + $0x34] ss:$8 sps:$4 sm:$0xff]   ;;  %v2184_v17 = vld [vmem:[#allocation2 + $0x30] ss:$8 sps:$4 sm:$0xff]   ;;  %v2185_v18 = vld [vmem:[#allocation2 + $0x24] ss:$8 sps:$4 sm:$0xff]  }
  0x4f   :  { %175 = vmatpush1.bf16.msra.mxu0 %v2169_v4  ;;  %v2187_v19 = vld [vmem:[#allocation2 + $0x20] ss:$8 sps:$4 sm:$0xff]   ;;  %v2188_v20 = vld [vmem:[#allocation2 + $0x14] ss:$8 sps:$4 sm:$0xff]   ;;  %v2674_v22 = vshrl.u32 %v126_v21, 7 }
  0x50   :  { %v124_v24 = vld [vmem:[#allocation10] ss:$8 sm:$0x3]  ;;  %v2190_v44 = vld [vmem:[#allocation2 + $0x10] ss:$8 sps:$4 sm:$0xff]  }
  0x51   :  { %490 = vmatpush1.bf16.msra.mxu1 %v2175_v11  ;;  %v2677_v23 = vsub.s32 0, %v2674_v22  ;;  %v2680_v25 = vsub.s32 1, %v2674_v22  ;;  %v2191_v45 = vld [vmem:[#allocation2 + $0x4] ss:$8 sps:$4 sm:$0xff]   ;;  %v2193_v46 = vld [vmem:[#allocation2] ss:$8 sps:$4 sm:$0xff]  }
  0x52   :  { %1946 = vmatmul.mubr.msk.bf16.vlgmr.msra.gmra.mxu0 %vm156_vm0, %v119_v7  ;;  %491 = vmatprep.subr.bf16.mxu1 %v2176_v12  ;;  %v2194_v47 = vld [vmem:[#allocation2 + $0xf4] ss:$8 sps:$4 sm:$0xff]   ;;  %v2196_v48 = vld [vmem:[#allocation2 + $0xf0] ss:$8 sps:$4 sm:$0xff]   ;;  %v2197_v49 = vld [vmem:[#allocation2 + $0xe4] ss:$8 sps:$4 sm:$0xff]  }
  0x53   :  { %v129_v26 = vrot.slane %v124_v24, %v2677_v23  ;;  %v133_v27 = vrot.slane %v124_v24, %v2680_v25  ;;  %v2199_v50 = vld [vmem:[#allocation2 + $0xe0] ss:$8 sps:$4 sm:$0xff]   ;;  %v2200_v51 = vld [vmem:[#allocation2 + $0xd4] ss:$8 sps:$4 sm:$0xff]   ;;  %v2202_v52 = vld [vmem:[#allocation2 + $0xd0] ss:$8 sps:$4 sm:$0xff]  }
  0x54   :  { %v2203_v53 = vld [vmem:[#allocation2 + $0xc4] ss:$8 sps:$4 sm:$0xff]   ;;  %v2205_v54 = vld [vmem:[#allocation2 + $0xc0] ss:$8 sps:$4 sm:$0xff]   ;;  %v2206_v55 = vld [vmem:[#allocation2 + $0xb4] ss:$8 sps:$4 sm:$0xff]  }
  0x55   :  { %492 = vmatpush1.bf16.msra.mxu1 %v2178_v13  ;;  %v2208_v56 = vld [vmem:[#allocation2 + $0xb0] ss:$8 sps:$4 sm:$0xff]   ;;  %v2209_v57 = vld [vmem:[#allocation2 + $0xa4] ss:$8 sps:$4 sm:$0xff]   ;;  %v2211_v58 = vld [vmem:[#allocation2 + $0xa0] ss:$8 sps:$4 sm:$0xff]  }
  0x56   :  { %493 = vmatprep.subr.bf16.mxu1 %v2179_v14  ;;  %v2212_v59 = vld [vmem:[#allocation2 + $0x94] ss:$8 sps:$4 sm:$0xff]   ;;  %v2214_v60 = vld [vmem:[#allocation2 + $0x90] ss:$8 sps:$4 sm:$0xff]   ;;  %v2215_v61 = vld [vmem:[#allocation2 + $0x84] ss:$8 sps:$4 sm:$0xff]  }
  0x57   :  { %v2217_v62 = vld [vmem:[#allocation2 + $0x80] ss:$8 sps:$4 sm:$0xff]  }
  0x59   :  { %494 = vmatpush1.bf16.msra.mxu1 %v2181_v15 }
  0x5a   :  { %495 = vmatprep.subr.bf16.mxu1 %v2182_v16  ;;  %v204_v16 = vld [vmem:[#allocation10 + $0x1] ss:$8 sm:$0x3] }
  0x5b   :  { %v250_v21 = vrot.slane %v204_v16, %v2677_v23  ;;  %v254_v24 = vrot.slane %v204_v16, %v2680_v25 }
  0x5d   :  { %496 = vmatpush1.bf16.msra.mxu1 %v2184_v17 }
  0x5e   :  { %497 = vmatprep.subr.bf16.mxu1 %v2185_v18 }
  0x61   :  { %498 = vmatpush1.bf16.msra.mxu1 %v2187_v19 }
  0x62   :  { %499 = vmatprep.subr.bf16.mxu1 %v2188_v20  ;;  %v206_v20 = vld [vmem:[#allocation10 + $0x2] ss:$8 sm:$0x3] }
  0x65   :  { %500 = vmatpush1.bf16.msra.mxu1 %v2190_v44 }
  0x66   :  { %501 = vmatprep.subr.bf16.mxu1 %v2191_v45 }
  0x69   :  { %502 = vmatpush1.bf16.msra.mxu1 %v2193_v46 }
  0x6a   :  { %503 = vmatprep.subr.bf16.mxu1 %v2194_v47 }
  0x6d   :  { %504 = vmatpush2.bf16.msra.mxu1 %v2196_v48 }
  0x6e   :  { %505 = vmatprep.subr.bf16.mxu1 %v2197_v49 }
  0x71   :  { %506 = vmatpush2.bf16.msra.mxu1 %v2199_v50 }
  0x72   :  { %507 = vmatprep.subr.bf16.mxu1 %v2200_v51  ;;  %v2223_v51 = vld [vmem:[#allocation4 + $0x64] ss:$8 sps:$4 sm:$0xff]  }
  0x75   :  { %508 = vmatpush2.bf16.msra.mxu1 %v2202_v52  ;;  %v2221_v52 = vld [vmem:[#allocation4 + $0x60] ss:$8 sps:$4 sm:$0xff]  }
  0x76   :  { %509 = vmatprep.subr.bf16.mxu1 %v2203_v53  ;;  %v2226_v53 = vld [vmem:[#allocation4 + $0x54] ss:$8 sps:$4 sm:$0xff]  }
  0x79   :  { %510 = vmatpush2.bf16.msra.mxu1 %v2205_v54  ;;  %v2224_v54 = vld [vmem:[#allocation4 + $0x50] ss:$8 sps:$4 sm:$0xff]  }
  0x7a   :  { %511 = vmatprep.subr.bf16.mxu1 %v2206_v55  ;;  %v2229_v55 = vld [vmem:[#allocation4 + $0x44] ss:$8 sps:$4 sm:$0xff]  }
  0x7d   :  { %512 = vmatpush2.bf16.msra.mxu1 %v2208_v56  ;;  %v2227_v56 = vld [vmem:[#allocation4 + $0x40] ss:$8 sps:$4 sm:$0xff]  }
  0x7e   :  { %513 = vmatprep.subr.bf16.mxu1 %v2209_v57  ;;  %v2232_v57 = vld [vmem:[#allocation4 + $0x34] ss:$8 sps:$4 sm:$0xff]  }
  0x81   :  { %514 = vmatpush2.bf16.msra.mxu1 %v2211_v58  ;;  %v2230_v58 = vld [vmem:[#allocation4 + $0x30] ss:$8 sps:$4 sm:$0xff]  }
  0x82   :  { %515 = vmatprep.subr.bf16.mxu1 %v2212_v59  ;;  %v2235_v59 = vld [vmem:[#allocation4 + $0x24] ss:$8 sps:$4 sm:$0xff]  }
  0x85   :  { %516 = vmatpush2.bf16.msra.mxu1 %v2214_v60  ;;  %v2233_v60 = vld [vmem:[#allocation4 + $0x20] ss:$8 sps:$4 sm:$0xff]  }
  0x86   :  { %517 = vmatprep.subr.bf16.mxu1 %v2215_v61  ;;  %v315_v61 = vld [vmem:[#allocation10 + $0x3] ss:$8 sm:$0x3] }
  0x89   :  { %518 = vmatpush2.bf16.msra.mxu1 %v2217_v62  ;;  %v320_v62 = vrot.slane %v315_v61, %v2677_v23 }
 0x112   :  { %v194_v28 = vpop.f32.mrf.mxu0 }
 0x113   :  { %v2684_v29 = vadd.f32 %v194_v28, %v129_v26  ;;  %v265_v28 = vrot.slane %v206_v20, %v2677_v23 }
 0x114   :  { %v196_v30 = vpop.f32.mrf.mxu0 }
 0x115   :  { %v2686_v31 = vadd.f32 %v196_v30, %v133_v27  ;;  %v216_v35 = vmul.f32 %v2684_v29, %v2684_v29  ;;  %v269_v30 = vrot.slane %v206_v20, %v2680_v25  ;;  %v2239_v20 = vld [vmem:[#allocation4] ss:$8 sps:$4 sm:$0xff]  }
 0x116   :  { %v198_v32 = vpop.f32.mrf.mxu0 }
 0x117   :  { %v2688_v33 = vadd.f32 %v198_v32, %v129_v26  ;;  %v207_v34 = vadd.f32 %v2686_v31, %v2684_v29  ;;  %v217_v36 = vmul.f32 %v2686_v31, %v2686_v31 }
 0x118   :  { %v200_v37 = vpop.f32.mrf.mxu0 }
 0x119   :  { %v2696_v38 = vadd.f32 %v200_v37, %v133_v27  ;;  %208 = vadd.xlane.f32.xlu0 %v207_v34  ;;  %v220_v39 = vadd.f32 %v217_v36, %v216_v35  ;;  %v218_v41 = vmul.f32 %v2688_v33, %v2688_v33 }
 0x11b   :  { %221 = vadd.xlane.f32.xlu1 %v220_v39  ;;  %v210_v40 = vadd.f32 %v2696_v38, %v2688_v33  ;;  %v219_v42 = vmul.f32 %v2696_v38, %v2696_v38 }
 0x11d   :  { %211 = vadd.xlane.f32.xlu0 %v210_v40  ;;  %v223_v43 = vadd.f32 %v219_v42, %v218_v41 }
 0x11f   :  { %224 = vadd.xlane.f32.xlu1 %v223_v43 }
 0x1a2   :  { %v209_v63 = vpop.xlane.xlu0 %208 }
 0x1a3   :  { %v214_v1 = vmul.f32 0.00390625, %v209_v63  ;;  %v324_v63 = vrot.slane %v315_v61, %v2680_v25 }
 0x1a4   :  { %v222_v2 = vpop.xlane.xlu1 %221 }
 0x1a5   :  { %v226_v3 = vmul.f32 0.00390625, %v222_v2  ;;  %v228_v4 = vmul.f32 %v214_v1, %v214_v1  ;;  %v234_v17 = vsub.f32 %v2684_v29, %v214_v1  ;;  %v235_v18 = vsub.f32 %v2686_v31, %v214_v1 }
 0x1a6   :  { %v212_v5 = vpop.xlane.xlu0 %211 }
 0x1a7   :  { %v230_v6 = vsub.f32 %v226_v3, %v228_v4  ;;  %v215_v7 = vmul.f32 0.00390625, %v212_v5 }
 0x1a8   :  { %v225_v8 = vpop.xlane.xlu1 %224 }
 0x1a9   :  { %v232_v9 = vmax.f32 %v230_v6, 0.0  ;;  %v227_v10 = vmul.f32 0.00390625, %v225_v8  ;;  %v229_v11 = vmul.f32 %v215_v7, %v215_v7  ;;  %v236_v32 = vsub.f32 %v2688_v33, %v215_v7  ;;  %v2218_v33 = vld [vmem:[#allocation4 + $0x70] ss:$8 sps:$4 sm:$0xff]  }
 0x1aa   :  { %v237_v34 = vsub.f32 %v2696_v38, %v215_v7  ;;  %v2220_v38 = vld [vmem:[#allocation4 + $0x74] ss:$8 sps:$4 sm:$0xff]  }
 0x1ab   :  { %v238_v12 = vadd.f32 1e-05, %v232_v9  ;;  %v231_v13 = vsub.f32 %v227_v10, %v229_v11  ;;  %813 = vmatprep.subr.bf16.mxu0 %v2220_v38 }
 0x1ac   :  { %814 = vmatpush1.bf16.msra.mxu0 %v2218_v33 }
 0x1ad   :  { %2410 = vrsqrt.f32 %v238_v12  ;;  %v233_v14 = vmax.f32 %v231_v13, 0.0  ;;  %815 = vmatprep.subr.bf16.mxu0 %v2223_v51 }
 0x1af   :  { %v239_v15 = vadd.f32 1e-05, %v233_v14 }
 0x1b0   :  { %816 = vmatpush1.bf16.msra.mxu0 %v2221_v52 }
 0x1b1   :  { %2412 = vrsqrt.f32 %v239_v15  ;;  %817 = vmatprep.subr.bf16.mxu0 %v2226_v53 }
 0x1b4   :  { %818 = vmatpush1.bf16.msra.mxu0 %v2224_v54 }
 0x1b5   :  { %819 = vmatprep.subr.bf16.mxu0 %v2229_v55 }
 0x1b8   :  { %820 = vmatpush1.bf16.msra.mxu0 %v2227_v56  ;;  %v531_v56 = vld [vmem:[#allocation10 + $0x4] ss:$8 sm:$0x3] }
 0x1b9   :  { %821 = vmatprep.subr.bf16.mxu0 %v2232_v57  ;;  %v580_v61 = vrot.slane %v531_v56, %v2680_v25 }
 0x1ba   :  { %v2411_v19 = vpop.eup %2410 }
 0x1bb   :  { %v243_v26 = vmul.f32 %v2411_v19, %v235_v18  ;;  %v242_v27 = vmul.f32 %v2411_v19, %v234_v17  ;;  %v2238_v17 = vld [vmem:[#allocation4 + $0x14] ss:$8 sps:$4 sm:$0xff]   ;;  %v2236_v18 = vld [vmem:[#allocation4 + $0x10] ss:$8 sps:$4 sm:$0xff]   ;;  %v2241_v19 = vld [vmem:[#allocation4 + $0x4] ss:$8 sps:$4 sm:$0xff]  }
 0x1bc   :  { %822 = vmatpush1.bf16.msra.mxu0 %v2230_v58 }
 0x1bd   :  { %v258_v35 = vmul.f32 %v254_v24, %v243_v26  ;;  %v257_v29 = vmul.f32 %v250_v21, %v242_v27  ;;  %823 = vmatprep.subr.bf16.mxu0 %v2235_v59  ;;  %v2247_v26 = vld [vmem:[#allocation4 + $0xe4] ss:$8 sps:$4 sm:$0xff]   ;;  %v2245_v27 = vld [vmem:[#allocation4 + $0xe0] ss:$8 sps:$4 sm:$0xff]  }
 0x1be   :  { %v2413_v36 = vpop.eup %2412  ;;  %v533_v59 = vld [vmem:[#allocation10 + $0x5] ss:$8 sm:$0x3] }
 0x1bf   :  { %v245_v31 = vmul.f32 %v2413_v36, %v237_v34  ;;  %v244_v37 = vmul.f32 %v2413_v36, %v236_v32  ;;  %v273_v40 = vadd.f32 %v269_v30, %v258_v35  ;;  %v272_v42 = vadd.f32 %v265_v28, %v257_v29  ;;  %v2253_v32 = vld [vmem:[#allocation4 + $0xc4] ss:$8 sps:$4 sm:$0xff]   ;;  %v2251_v34 = vld [vmem:[#allocation4 + $0xc0] ss:$8 sps:$4 sm:$0xff]   ;;  %v2256_v35 = vld [vmem:[#allocation4 + $0xb4] ss:$8 sps:$4 sm:$0xff]  }
 0x1c0   :  { %824 = vmatpush1.bf16.msra.mxu0 %v2233_v60  ;;  %v2254_v29 = vld [vmem:[#allocation4 + $0xb0] ss:$8 sps:$4 sm:$0xff]   ;;  %v2259_v36 = vld [vmem:[#allocation4 + $0xa4] ss:$8 sps:$4 sm:$0xff]   ;;  %v576_v60 = vrot.slane %v531_v56, %v2677_v23 }
 0x1c1   :  { %v260_v39 = vmul.f32 %v254_v24, %v245_v31  ;;  %v259_v41 = vmul.f32 %v250_v21, %v244_v37  ;;  %v277_v45 = vmax.f32 %v273_v40, 0.0  ;;  %v276_v47 = vmax.f32 %v272_v42, 0.0  ;;  %825 = vmatprep.subr.bf16.mxu0 %v2238_v17  ;;  %v2244_v21 = vld [vmem:[#allocation4 + $0xf4] ss:$8 sps:$4 sm:$0xff]   ;;  %v2242_v24 = vld [vmem:[#allocation4 + $0xf0] ss:$8 sps:$4 sm:$0xff]  }
 0x1c2   :  { %v2257_v31 = vld [vmem:[#allocation4 + $0xa0] ss:$8 sps:$4 sm:$0xff]   ;;  %v2262_v37 = vld [vmem:[#allocation4 + $0x94] ss:$8 sps:$4 sm:$0xff]   ;;  %v2265_v40 = vld [vmem:[#allocation4 + $0x84] ss:$8 sps:$4 sm:$0xff]  }
 0x1c3   :  { %v275_v43 = vadd.f32 %v269_v30, %v260_v39  ;;  %v274_v44 = vadd.f32 %v265_v28, %v259_v41  ;;  %v2250_v28 = vld [vmem:[#allocation4 + $0xd4] ss:$8 sps:$4 sm:$0xff]   ;;  %v2248_v30 = vld [vmem:[#allocation4 + $0xd0] ss:$8 sps:$4 sm:$0xff]   ;;  %v2263_v41 = vld [vmem:[#allocation4 + $0x80] ss:$8 sps:$4 sm:$0xff]  }
 0x1c4   :  { %826 = vmatpush1.bf16.msra.mxu0 %v2236_v18  ;;  %v2260_v39 = vld [vmem:[#allocation4 + $0x90] ss:$8 sps:$4 sm:$0xff]  }
 0x1c5   :  { %v279_v46 = vmax.f32 %v275_v43, 0.0  ;;  %v278_v48 = vmax.f32 %v274_v44, 0.0  ;;  %827 = vmatprep.subr.bf16.mxu0 %v2241_v19  ;;  %v2311_v56 = vld [vmem:[#allocation6 + $0x8] ss:$16 sps:$4 sm:$0xff]  }
 0x1c7   :  { %v281_v49 = vpack.c.bf16 %v279_v46, %v277_v45  ;;  %v280_v50 = vpack.c.bf16 %v278_v48, %v276_v47 }
 0x1c8   :  { %828 = vmatpush1.bf16.msra.mxu0 %v2239_v20 }
 0x1c9   :  { %519 = vmatprep.mubr.bf16.mxu1 %v281_v49  ;;  %829 = vmatprep.subr.bf16.mxu0 %v2244_v21 }
 0x1ca   :  { %520 = vmatmul.mubr.bf16.vlgmr.msra.gmra.mxu1 %v280_v50 }
 0x1cb   :  { %1114 = vmatprep.mubr.bf16.mxu1 %v2574_v0 }
 0x1cc   :  { %830 = vmatpush2.bf16.msra.mxu0 %v2242_v24 }
 0x1cd   :  { %831 = vmatprep.subr.bf16.mxu0 %v2247_v26 }
 0x1d0   :  { %832 = vmatpush2.bf16.msra.mxu0 %v2245_v27 }
 0x1d1   :  { %833 = vmatprep.subr.bf16.mxu0 %v2250_v28  ;;  %v2266_v28 = vld [vmem:[#allocation6 + $0xe0] ss:$16 sps:$4 sm:$0xff]  }
 0x1d4   :  { %834 = vmatpush2.bf16.msra.mxu0 %v2248_v30  ;;  %v2269_v30 = vld [vmem:[#allocation6 + $0xe8] ss:$16 sps:$4 sm:$0xff]  }
 0x1d5   :  { %835 = vmatprep.subr.bf16.mxu0 %v2253_v32  ;;  %v2274_v32 = vld [vmem:[#allocation6 + $0xc4] ss:$16 sps:$4 sm:$0xff]  }
 0x1d8   :  { %836 = vmatpush2.bf16.msra.mxu0 %v2251_v34  ;;  %v2277_v34 = vld [vmem:[#allocation6 + $0xcc] ss:$16 sps:$4 sm:$0xff]  }
 0x1d9   :  { %837 = vmatprep.subr.bf16.mxu0 %v2256_v35  ;;  %v2272_v35 = vld [vmem:[#allocation6 + $0xc0] ss:$16 sps:$4 sm:$0xff]  }
 0x1dc   :  { %838 = vmatpush2.bf16.msra.mxu0 %v2254_v29  ;;  %v2275_v29 = vld [vmem:[#allocation6 + $0xc8] ss:$16 sps:$4 sm:$0xff]  }
 0x1dd   :  { %839 = vmatprep.subr.bf16.mxu0 %v2259_v36  ;;  %v2280_v36 = vld [vmem:[#allocation6 + $0xa4] ss:$16 sps:$4 sm:$0xff]  }
 0x1e0   :  { %840 = vmatpush2.bf16.msra.mxu0 %v2257_v31  ;;  %v2283_v31 = vld [vmem:[#allocation6 + $0xac] ss:$16 sps:$4 sm:$0xff]  }
 0x1e1   :  { %841 = vmatprep.subr.bf16.mxu0 %v2262_v37  ;;  %v2278_v37 = vld [vmem:[#allocation6 + $0xa0] ss:$16 sps:$4 sm:$0xff]  }
 0x1e4   :  { %842 = vmatpush2.bf16.msra.mxu0 %v2260_v39  ;;  %v2286_v39 = vld [vmem:[#allocation6 + $0x84] ss:$16 sps:$4 sm:$0xff]  }
 0x1e5   :  { %843 = vmatprep.subr.bf16.mxu0 %v2265_v40  ;;  %v2289_v40 = vld [vmem:[#allocation6 + $0x8c] ss:$16 sps:$4 sm:$0xff]  }
 0x1e8   :  { %844 = vmatpush2.bf16.msra.mxu0 %v2263_v41  ;;  %v2284_v41 = vld [vmem:[#allocation6 + $0x80] ss:$16 sps:$4 sm:$0xff]  }
 0x28a   :  { %v521_v1 = vpop.f32.mrf.mxu1 }
 0x28b   :  { %v2715_v3 = vadd.f32 %v521_v1, %v320_v62 }
 0x28c   :  { %v523_v2 = vpop.f32.mrf.mxu1 }
 0x28d   :  { %v2717_v4 = vadd.f32 %v523_v2, %v324_v63  ;;  %v542_v11 = vmul.f32 %v2715_v3, %v2715_v3  ;;  %v591_v2 = vrot.slane %v533_v59, %v2677_v23 }
 0x28e   :  { %v525_v5 = vpop.f32.mrf.mxu1 }
 0x28f   :  { %v534_v6 = vadd.f32 %v2717_v4, %v2715_v3  ;;  %v543_v7 = vmul.f32 %v2717_v4, %v2717_v4  ;;  %v2723_v9 = vadd.f32 %v525_v5, %v320_v62  ;;  %v595_v5 = vrot.slane %v533_v59, %v2680_v25 }
 0x290   :  { %v527_v8 = vpop.f32.mrf.mxu1 }
 0x291   :  { %v2725_v10 = vadd.f32 %v527_v8, %v324_v63  ;;  %535 = vadd.xlane.f32.xlu0 %v534_v6  ;;  %v546_v13 = vadd.f32 %v543_v7, %v542_v11  ;;  %v544_v15 = vmul.f32 %v2723_v9, %v2723_v9 }
 0x293   :  { %v537_v12 = vadd.f32 %v2725_v10, %v2723_v9  ;;  %v545_v14 = vmul.f32 %v2725_v10, %v2725_v10 }
 0x295   :  { %538 = vadd.xlane.f32.xlu1 %v537_v12  ;;  %547 = vadd.xlane.f32.xlu0 %v546_v13  ;;  %v549_v16 = vadd.f32 %v545_v14, %v544_v15 }
 0x299   :  { %550 = vadd.xlane.f32.xlu1 %v549_v16 }
 0x31a   :  { %v536_v42 = vpop.xlane.xlu0 %535 }
 0x31b   :  { %v540_v43 = vmul.f32 0.00390625, %v536_v42  ;;  %v2287_v42 = vld [vmem:[#allocation6 + $0x88] ss:$16 sps:$4 sm:$0xff]  }
 0x31d   :  { %v554_v47 = vmul.f32 %v540_v43, %v540_v43  ;;  %v560_v57 = vsub.f32 %v2715_v3, %v540_v43  ;;  %v561_v58 = vsub.f32 %v2717_v4, %v540_v43  ;;  %v2292_v43 = vld [vmem:[#allocation6 + $0x64] ss:$16 sps:$4 sm:$0xff]  }
 0x31e   :  { %v539_v44 = vpop.xlane.xlu1 %538  ;;  %v548_v45 = vpop.xlane.xlu0 %547 }
 0x31f   :  { %v541_v46 = vmul.f32 0.00390625, %v539_v44  ;;  %v552_v48 = vmul.f32 0.00390625, %v548_v45  ;;  %v2290_v44 = vld [vmem:[#allocation6 + $0x60] ss:$16 sps:$4 sm:$0xff]   ;;  %v2293_v45 = vld [vmem:[#allocation6 + $0x68] ss:$16 sps:$4 sm:$0xff]  }
 0x321   :  { %v556_v49 = vsub.f32 %v552_v48, %v554_v47  ;;  %v555_v38 = vmul.f32 %v541_v46, %v541_v46  ;;  %v562_v6 = vsub.f32 %v2723_v9, %v541_v46  ;;  %v563_v7 = vsub.f32 %v2725_v10, %v541_v46  ;;  %v2268_v9 = vld [vmem:[#allocation6 + $0xe4] ss:$16 sps:$4 sm:$0xff]   ;;  %v2271_v10 = vld [vmem:[#allocation6 + $0xec] ss:$16 sps:$4 sm:$0xff]  }
 0x322   :  { %v551_v50 = vpop.xlane.xlu1 %550  ;;  %1082 = vmatprep.subr.bf16.mxu1 %v2268_v9  ;;  %1125 = vmatprep.subr.bf16.mxu0 %v2271_v10  ;;  %v2295_v46 = vld [vmem:[#allocation6 + $0x6c] ss:$16 sps:$4 sm:$0xff]   ;;  %v2298_v47 = vld [vmem:[#allocation6 + $0x44] ss:$16 sps:$4 sm:$0xff]   ;;  %v2320_v9 = vld [vmem:[#allocation7 + $0x50] ss:$8 sps:$4 sm:$0xff]  }
 0x323   :  { %v558_v33 = vmax.f32 %v556_v49, 0.0  ;;  %v553_v51 = vmul.f32 0.00390625, %v551_v50  ;;  %1083 = vmatpush1.bf16.msra.mxu1 %v2266_v28  ;;  %v2301_v48 = vld [vmem:[#allocation6 + $0x4c] ss:$16 sps:$4 sm:$0xff]   ;;  %v2296_v49 = vld [vmem:[#allocation6 + $0x40] ss:$16 sps:$4 sm:$0xff]  }
 0x324   :  { %1084 = vmatprep.subr.bf16.mxu1 %v2274_v32  ;;  %v2299_v50 = vld [vmem:[#allocation6 + $0x48] ss:$16 sps:$4 sm:$0xff]   ;;  %v2325_v10 = vld [vmem:[#allocation7 + $0x44] ss:$8 sps:$4 sm:$0xff]  }
 0x325   :  { %v564_v52 = vadd.f32 1e-05, %v558_v33  ;;  %v557_v53 = vsub.f32 %v553_v51, %v555_v38  ;;  %v2304_v33 = vld [vmem:[#allocation6 + $0x24] ss:$16 sps:$4 sm:$0xff]   ;;  %v2307_v38 = vld [vmem:[#allocation6 + $0x2c] ss:$16 sps:$4 sm:$0xff]  }
 0x326   :  { %v2302_v51 = vld [vmem:[#allocation6 + $0x20] ss:$16 sps:$4 sm:$0xff]  }
 0x327   :  { %2414 = vrsqrt.f32 %v564_v52  ;;  %v559_v54 = vmax.f32 %v557_v53, 0.0  ;;  %1085 = vmatpush1.bf16.msra.mxu1 %v2272_v35  ;;  %v2305_v52 = vld [vmem:[#allocation6 + $0x28] ss:$16 sps:$4 sm:$0xff]   ;;  %v2310_v53 = vld [vmem:[#allocation6 + $0x4] ss:$16 sps:$4 sm:$0xff]  }
 0x328   :  { %1086 = vmatprep.subr.bf16.mxu1 %v2280_v36  ;;  %v2323_v28 = vld [vmem:[#allocation7 + $0x40] ss:$8 sps:$4 sm:$0xff]   ;;  %v2326_v32 = vld [vmem:[#allocation7 + $0x30] ss:$8 sps:$4 sm:$0xff]  }
 0x329   :  { %v565_v55 = vadd.f32 1e-05, %v559_v54  ;;  %v2313_v54 = vld [vmem:[#allocation6 + $0xc] ss:$16 sps:$4 sm:$0xff]   ;;  %v2329_v35 = vld [vmem:[#allocation7 + $0x20] ss:$8 sps:$4 sm:$0xff]  }
 0x32b   :  { %2416 = vrsqrt.f32 %v565_v55  ;;  %1087 = vmatpush1.bf16.msra.mxu1 %v2278_v37  ;;  %v2308_v55 = vld [vmem:[#allocation6] ss:$16 sps:$4 sm:$0xff]  }
 0x32c   :  { %1088 = vmatprep.subr.bf16.mxu1 %v2286_v39 }
 0x32f   :  { %1089 = vmatpush1.bf16.msra.mxu1 %v2284_v41 }
 0x330   :  { %1090 = vmatprep.subr.bf16.mxu1 %v2292_v43 }
 0x333   :  { %1091 = vmatpush1.bf16.msra.mxu1 %v2290_v44 }
 0x334   :  { %v2415_v62 = vpop.eup %2414  ;;  %1092 = vmatprep.subr.bf16.mxu1 %v2298_v47 }
 0x335   :  { %v569_v63 = vmul.f32 %v2415_v62, %v561_v58  ;;  %v568_v1 = vmul.f32 %v2415_v62, %v560_v57  ;;  %v641_v57 = vld [vmem:[#allocation10 + $0x6] ss:$8 sm:$0x3] }
 0x336   :  { %v646_v58 = vrot.slane %v641_v57, %v2677_v23  ;;  %v650_v59 = vrot.slane %v641_v57, %v2680_v25  ;;  %v2343_v57 = vld [vmem:[#allocation7 + $0xe4] ss:$8 sps:$4 sm:$0xff]  }
 0x337   :  { %v584_v8 = vmul.f32 %v580_v61, %v569_v63  ;;  %v583_v3 = vmul.f32 %v576_v60, %v568_v1  ;;  %1093 = vmatpush1.bf16.msra.mxu1 %v2296_v49 }
 0x338   :  { %v2417_v11 = vpop.eup %2416  ;;  %1094 = vmatprep.subr.bf16.mxu1 %v2304_v33 }
 0x339   :  { %v571_v4 = vmul.f32 %v2417_v11, %v563_v7  ;;  %v570_v12 = vmul.f32 %v2417_v11, %v562_v6  ;;  %v599_v14 = vadd.f32 %v595_v5, %v584_v8  ;;  %v598_v16 = vadd.f32 %v591_v2, %v583_v3 }
 0x33b   :  { %v586_v13 = vmul.f32 %v580_v61, %v571_v4  ;;  %v585_v15 = vmul.f32 %v576_v60, %v570_v12  ;;  %v603_v19 = vmax.f32 %v599_v14, 0.0  ;;  %v602_v21 = vmax.f32 %v598_v16, 0.0  ;;  %1095 = vmatpush1.bf16.msra.mxu1 %v2302_v51  ;;  %v117_v12 = vld [vmem:[%s2885_s1] sm:$0xff]  ;;  %v2334_v51 = vld [vmem:[#allocation7 + $0x14] ss:$8 sps:$4 sm:$0xff]  }
 0x33c   :  { %1096 = vmatprep.subr.bf16.mxu1 %v2310_v53  ;;  %v2337_v53 = vld [vmem:[#allocation7 + $0x4] ss:$8 sps:$4 sm:$0xff]  }
 0x33d   :  { %v601_v17 = vadd.f32 %v595_v5, %v586_v13  ;;  %v600_v18 = vadd.f32 %v591_v2, %v585_v15  ;;  %v118_v13 = vld [vmem:[%s2885_s1 + $0x8] sm:$0xff] }
 0x33f   :  { %v605_v20 = vmax.f32 %v601_v17, 0.0  ;;  %v604_v24 = vmax.f32 %v600_v18, 0.0  ;;  %1097 = vmatpush1.bf16.msra.mxu1 %v2308_v55  ;;  %v2340_v55 = vld [vmem:[#allocation7 + $0xf4] ss:$8 sps:$4 sm:$0xff]  }
 0x341   :  { %v607_v26 = vpack.c.bf16 %v605_v20, %v603_v19  ;;  %v606_v27 = vpack.c.bf16 %v604_v24, %v602_v21  ;;  %v2314_v20 = vld [vmem:[#allocation7 + $0x70] ss:$8 sps:$4 sm:$0xff]   ;;  %v2316_v21 = vld [vmem:[#allocation7 + $0x74] ss:$8 sps:$4 sm:$0xff]   ;;  %v2319_v24 = vld [vmem:[#allocation7 + $0x64] ss:$8 sps:$4 sm:$0xff]  }
 0x342   :  { %1527 = vmatprep.subr.bf16.mxu1 %v2316_v21 }
 0x343   :  { %845 = vmatprep.mubr.bf16.mxu0 %v607_v26  ;;  %v2317_v26 = vld [vmem:[#allocation7 + $0x60] ss:$8 sps:$4 sm:$0xff]  }
 0x344   :  { %846 = vmatmul.mubr.bf16.vlgmr.msra.gmra.mxu0 %v606_v27  ;;  %v2322_v27 = vld [vmem:[#allocation7 + $0x54] ss:$8 sps:$4 sm:$0xff]  }
 0x345   :  { %1157 = vmatprep.mubr.bf16.mxu0 %v2574_v0  ;;  %1126 = vmatpush1.bf16.msra.mxu0 %v2269_v30  ;;  %v2281_v0 = vld [vmem:[#allocation6 + $0xa8] ss:$16 sps:$4 sm:$0xff]   ;;  %v2328_v30 = vld [vmem:[#allocation7 + $0x34] ss:$8 sps:$4 sm:$0xff]  }
 0x346   :  { %1127 = vmatprep.subr.bf16.mxu0 %v2277_v34  ;;  %v2331_v34 = vld [vmem:[#allocation7 + $0x24] ss:$8 sps:$4 sm:$0xff]  }
 0x349   :  { %1128 = vmatpush1.bf16.msra.mxu0 %v2275_v29  ;;  %v2764_v29 = vld [vmem:[#allocation10 + $0x7] ss:$8 sm:$0xf] }
 0x34a   :  { %1129 = vmatprep.subr.bf16.mxu0 %v2283_v31  ;;  %v905_v36 = vrot.slane %v2764_v29, %v2677_v23  ;;  %v909_v31 = vrot.slane %v2764_v29, %v2680_v25 }
 0x34d   :  { %1130 = vmatpush1.bf16.msra.mxu0 %v2281_v0 }
 0x34e   :  { %1131 = vmatprep.subr.bf16.mxu0 %v2289_v40 }
 0x351   :  { %1132 = vmatpush1.bf16.msra.mxu0 %v2287_v42 }
 0x352   :  { %1133 = vmatprep.subr.bf16.mxu0 %v2295_v46 }
 0x355   :  { %1134 = vmatpush1.bf16.msra.mxu0 %v2293_v45 }
 0x356   :  { %1135 = vmatprep.subr.bf16.mxu0 %v2301_v48 }
 0x359   :  { %1136 = vmatpush1.bf16.msra.mxu0 %v2299_v50 }
 0x35a   :  { %1137 = vmatprep.subr.bf16.mxu0 %v2307_v38 }
 0x35d   :  { %1138 = vmatpush1.bf16.msra.mxu0 %v2305_v52  ;;  %v2332_v52 = vld [vmem:[#allocation7 + $0x10] ss:$8 sps:$4 sm:$0xff]  }
 0x35e   :  { %1139 = vmatprep.subr.bf16.mxu0 %v2313_v54  ;;  %v2335_v54 = vld [vmem:[#allocation7] ss:$8 sps:$4 sm:$0xff]  }
 0x361   :  { %1140 = vmatpush1.bf16.msra.mxu0 %v2311_v56  ;;  %v2338_v56 = vld [vmem:[#allocation7 + $0xf0] ss:$8 sps:$4 sm:$0xff]  }
 0x404   :  { %v847_v60 = vpop.f32.mrf.mxu0 }
 0x405   :  { %v848_v61 = vadd.f32 %v847_v60, %v646_v58  ;;  %v2344_v60 = vld [vmem:[#allocation7 + $0xd0] ss:$8 sps:$4 sm:$0xff]  }
 0x406   :  { %v849_v62 = vpop.f32.mrf.mxu0 }
 0x407   :  { %1928 = vst [vmem:[%s2893_s9 + $0x8] sm:$0xff] %v848_v61  ;;  %v850_v63 = vadd.f32 %v849_v62, %v650_v59  ;;  %v2347_v62 = vld [vmem:[#allocation7 + $0xc0] ss:$8 sps:$4 sm:$0xff]  }
 0x408   :  { %v851_v1 = vpop.f32.mrf.mxu0 }
 0x409   :  { %v856_v2 = vmul.f32 0.5, %v850_v63  ;;  %1929 = vst [vmem:[%s2893_s9 + $0x10] sm:$0xff] %v850_v63  ;;  %v852_v5 = vadd.f32 %v851_v1, %v646_v58  ;;  %v2341_v58 = vld [vmem:[#allocation7 + $0xe0] ss:$8 sps:$4 sm:$0xff]   ;;  %v2352_v63 = vld [vmem:[#allocation7 + $0xb4] ss:$8 sps:$4 sm:$0xff]  }
 0x40a   :  { %v853_v6 = vpop.f32.mrf.mxu0  ;;  %v2350_v1 = vld [vmem:[#allocation7 + $0xb0] ss:$8 sps:$4 sm:$0xff]  }
 0x40b   :  { %v858_v7 = vmul.f32 1.442695, %v856_v2  ;;  %1930 = vst [vmem:[%s2893_s9 + $0x28] sm:$0xff] %v852_v5  ;;  %v854_v8 = vadd.f32 %v853_v6, %v650_v59  ;;  %v2346_v59 = vld [vmem:[#allocation7 + $0xd4] ss:$8 sps:$4 sm:$0xff]  }
 0x40c   :  { %v2355_v2 = vld [vmem:[#allocation7 + $0xa4] ss:$8 sps:$4 sm:$0xff]   ;;  %v2358_v6 = vld [vmem:[#allocation7 + $0x94] ss:$8 sps:$4 sm:$0xff]  }
 0x40d   :  { %2418 = vpow2.f32 %v858_v7  ;;  %v857_v3 = vmul.f32 0.5, %v854_v8  ;;  %1931 = vst [vmem:[%s2893_s9 + $0x30] sm:$0xff] %v854_v8  ;;  %v2356_v7 = vld [vmem:[#allocation7 + $0x90] ss:$8 sps:$4 sm:$0xff]   ;;  %v2361_v8 = vld [vmem:[#allocation7 + $0x84] ss:$8 sps:$4 sm:$0xff]  }
 0x40f   :  { %v860_v11 = vmul.f32 1.442695, %v857_v3  ;;  %v2359_v3 = vld [vmem:[#allocation7 + $0x80] ss:$8 sps:$4 sm:$0xff]  }
 0x411   :  { %2420 = vpow2.f32 %v860_v11 }
 0x41a   :  { %v2419_v4 = vpop.eup %2418 }
 0x41b   :  { %v862_v14 = vmul.f32 %v2419_v4, %v117_v12 }
 0x41d   :  { %v864_v17 = vadd.f32 %v862_v14, %v848_v61  ;;  %v2349_v61 = vld [vmem:[#allocation7 + $0xc4] ss:$8 sps:$4 sm:$0xff]  }
 0x41e   :  { %v2421_v15 = vpop.eup %2420 }
 0x41f   :  { %v863_v16 = vmul.f32 %v2421_v15, %v118_v13 }
 0x421   :  { %v865_v18 = vadd.f32 %v863_v16, %v852_v5  ;;  %v2353_v5 = vld [vmem:[#allocation7 + $0xa0] ss:$8 sps:$4 sm:$0xff]  }
 0x423   :  { %v866_v19 = vpack.c.bf16 %v865_v18, %v864_v17 }
 0x425   :  { %1115 = vmatmul.mubr.bf16.vlgmr.msra.gmra.mxu1 %v866_v19  ;;  %1158 = vmatmul.mubr.bf16.vlgmr.msra.gmra.mxu0 %v866_v19 }
 0x426   :  { %1528 = vmatpush1.bf16.msra.mxu1 %v2314_v20 }
 0x427   :  { %1529 = vmatprep.subr.bf16.mxu1 %v2319_v24 }
 0x42a   :  { %1530 = vmatpush1.bf16.msra.mxu1 %v2317_v26 }
 0x42b   :  { %1531 = vmatprep.subr.bf16.mxu1 %v2322_v27 }
 0x42e   :  { %1532 = vmatpush1.bf16.msra.mxu1 %v2320_v9 }
 0x42f   :  { %1533 = vmatprep.subr.bf16.mxu1 %v2325_v10  ;;  %v1169_v10 = vld [vmem:[#allocation10 + $0x20] ss:$8 sm:$0x3] }
 0x432   :  { %1534 = vmatpush1.bf16.msra.mxu1 %v2323_v28 }
 0x433   :  { %1535 = vmatprep.subr.bf16.mxu1 %v2328_v30 }
 0x436   :  { %1536 = vmatpush1.bf16.msra.mxu1 %v2326_v32  ;;  %v1171_v32 = vld [vmem:[#allocation10 + $0x21] ss:$8 sm:$0x3] }
 0x437   :  { %1537 = vmatprep.subr.bf16.mxu1 %v2331_v34  ;;  %v1214_v34 = vrot.slane %v1169_v10, %v2677_v23 }
 0x43a   :  { %1538 = vmatpush1.bf16.msra.mxu1 %v2329_v35  ;;  %v1218_v35 = vrot.slane %v1169_v10, %v2680_v25 }
 0x43b   :  { %1539 = vmatprep.subr.bf16.mxu1 %v2334_v51 }
 0x43e   :  { %1540 = vmatpush1.bf16.msra.mxu1 %v2332_v52 }
 0x43f   :  { %1541 = vmatprep.subr.bf16.mxu1 %v2337_v53 }
 0x442   :  { %1542 = vmatpush1.bf16.msra.mxu1 %v2335_v54 }
 0x443   :  { %1543 = vmatprep.subr.bf16.mxu1 %v2340_v55 }
 0x446   :  { %1544 = vmatpush2.bf16.msra.mxu1 %v2338_v56 }
 0x447   :  { %1545 = vmatprep.subr.bf16.mxu1 %v2343_v57 }
 0x44a   :  { %1546 = vmatpush2.bf16.msra.mxu1 %v2341_v58 }
 0x44b   :  { %1547 = vmatprep.subr.bf16.mxu1 %v2346_v59 }
 0x44e   :  { %1548 = vmatpush2.bf16.msra.mxu1 %v2344_v60 }
 0x44f   :  { %1549 = vmatprep.subr.bf16.mxu1 %v2349_v61 }
 0x452   :  { %1550 = vmatpush2.bf16.msra.mxu1 %v2347_v62  ;;  %v916_v62 = vsub.s32 3, %v2674_v22 }
 0x453   :  { %1551 = vmatprep.subr.bf16.mxu1 %v2352_v63 }
 0x456   :  { %1552 = vmatpush2.bf16.msra.mxu1 %v2350_v1 }
 0x457   :  { %1553 = vmatprep.subr.bf16.mxu1 %v2355_v2  ;;  %v912_v2 = vsub.s32 2, %v2674_v22 }
 0x45a   :  { %1554 = vmatpush2.bf16.msra.mxu1 %v2353_v5 }
 0x45b   :  { %1555 = vmatprep.subr.bf16.mxu1 %v2358_v6 }
 0x45e   :  { %1556 = vmatpush2.bf16.msra.mxu1 %v2356_v7 }
 0x45f   :  { %1557 = vmatprep.subr.bf16.mxu1 %v2361_v8  ;;  %v917_v8 = vrot.slane %v2764_v29, %v916_v62 }
 0x462   :  { %1558 = vmatpush2.bf16.msra.mxu1 %v2359_v3 }
 0x4e5   :  { %v1116_v37 = vpop.f32.mrf.mxu1 }
 0x4e6   :  { %v2770_v39 = vadd.f32 %v1116_v37, %v905_v36 }
 0x4e7   :  { %v1118_v0 = vpop.f32.mrf.mxu1 }
 0x4e8   :  { %v2772_v40 = vadd.f32 %v1118_v0, %v909_v31  ;;  %v1180_v47 = vmul.f32 %v2770_v39, %v2770_v39  ;;  %v1229_v0 = vrot.slane %v1171_v32, %v2677_v23 }
 0x4e9   :  { %v1120_v41 = vpop.f32.mrf.mxu1 }
 0x4ea   :  { %v1172_v42 = vadd.f32 %v2772_v40, %v2770_v39  ;;  %v1181_v43 = vmul.f32 %v2772_v40, %v2772_v40  ;;  %v2778_v45 = vadd.f32 %v1120_v41, %v905_v36  ;;  %v1233_v41 = vrot.slane %v1171_v32, %v2680_v25 }
 0x4eb   :  { %v1122_v44 = vpop.f32.mrf.mxu1 }
 0x4ec   :  { %v2780_v46 = vadd.f32 %v1122_v44, %v909_v31  ;;  %1173 = vadd.xlane.f32.xlu0 %v1172_v42  ;;  %v1184_v49 = vadd.f32 %v1181_v43, %v1180_v47  ;;  %v1182_v33 = vmul.f32 %v2778_v45, %v2778_v45 }
 0x4ee   :  { %v1175_v48 = vadd.f32 %v2780_v46, %v2778_v45  ;;  %v1183_v50 = vmul.f32 %v2780_v46, %v2780_v46 }
 0x4f0   :  { %1176 = vadd.xlane.f32.xlu1 %v1175_v48  ;;  %1185 = vadd.xlane.f32.xlu0 %v1184_v49  ;;  %v1187_v38 = vadd.f32 %v1183_v50, %v1182_v33 }
 0x4f4   :  { %1188 = vadd.xlane.f32.xlu1 %v1187_v38 }
 0x575   :  { %v1174_v11 = vpop.xlane.xlu0 %1173 }
 0x576   :  { %v1178_v4 = vmul.f32 0.00390625, %v1174_v11 }
 0x578   :  { %v1192_v15 = vmul.f32 %v1178_v4, %v1178_v4  ;;  %v1198_v28 = vsub.f32 %v2770_v39, %v1178_v4  ;;  %v1199_v30 = vsub.f32 %v2772_v40, %v1178_v4 }
 0x579   :  { %v1177_v12 = vpop.xlane.xlu1 %1176  ;;  %v1186_v13 = vpop.xlane.xlu0 %1185 }
 0x57a   :  { %v1179_v14 = vmul.f32 0.00390625, %v1177_v12  ;;  %v1190_v16 = vmul.f32 0.00390625, %v1186_v13  ;;  %v913_v13 = vrot.slane %v2764_v29, %v912_v2 }
 0x57c   :  { %v1194_v17 = vsub.f32 %v1190_v16, %v1192_v15  ;;  %v1193_v20 = vmul.f32 %v1179_v14, %v1179_v14  ;;  %v1200_v42 = vsub.f32 %v2778_v45, %v1179_v14  ;;  %v1201_v43 = vsub.f32 %v2780_v46, %v1179_v14  ;;  %v1355_v45 = vld [vmem:[#allocation10 + $0x24] ss:$8 sm:$0x3]  ;;  %v1159_v46 = vpop.f32.mrf.mxu0 }
 0x57d   :  { %v1189_v18 = vpop.xlane.xlu1 %1188  ;;  %v1360_v59 = vrot.slane %v1355_v45, %v2677_v23  ;;  %v1364_v60 = vrot.slane %v1355_v45, %v2680_v25 }
 0x57e   :  { %v1196_v19 = vmax.f32 %v1194_v17, 0.0  ;;  %v1191_v21 = vmul.f32 0.00390625, %v1189_v18  ;;  %v1161_v63 = vpop.f32.mrf.mxu0 }
 0x57f   :  { %v2818_v16 = vadd.f32 %v1161_v63, %v917_v8 }
 0x580   :  { %v1202_v24 = vadd.f32 1e-05, %v1196_v19  ;;  %v1195_v26 = vsub.f32 %v1191_v21, %v1193_v20  ;;  %v1163_v4 = vpop.f32.mrf.mxu0  ;;  %v2824_v21 = vadd.f32 %v1159_v46, %v913_v13 }
 0x581   :  { %v2834_v10 = vadd.f32 %v1163_v4, %v913_v13 }
 0x582   :  { %2422 = vrsqrt.f32 %v1202_v24  ;;  %v1197_v27 = vmax.f32 %v1195_v26, 0.0  ;;  %v1165_v20 = vpop.f32.mrf.mxu0 }
 0x583   :  { %v2828_v24 = vadd.f32 %v1165_v20, %v917_v8 }
 0x584   :  { %v1203_v9 = vadd.f32 1e-05, %v1197_v27  ;;  %v1248_v27 = vadd.f32 %v2818_v16, %v2824_v21 }
 0x586   :  { %2424 = vrsqrt.f32 %v1203_v9  ;;  %v1257_v9 = vmul.f32 %v2818_v16, %v2818_v16 }
 0x58f   :  { %v2423_v36 = vpop.eup %2422 }
 0x590   :  { %v1207_v31 = vmul.f32 %v2423_v36, %v1199_v30  ;;  %v1206_v37 = vmul.f32 %v2423_v36, %v1198_v28  ;;  %v1256_v28 = vmul.f32 %v2824_v21, %v2824_v21  ;;  %v1251_v30 = vadd.f32 %v2828_v24, %v2834_v10 }
 0x592   :  { %v1222_v44 = vmul.f32 %v1218_v35, %v1207_v31  ;;  %v1221_v39 = vmul.f32 %v1214_v34, %v1206_v37  ;;  %v1260_v32 = vadd.f32 %v1257_v9, %v1256_v28  ;;  %v2362_v31 = vld [vmem:[#allocation9 + $0xf0] ss:$8 sps:$4 sm:$0xff]   ;;  %v1571_v28 = vld [vmem:[#allocation10 + $0x25] ss:$8 sm:$0x3] }
 0x593   :  { %v2425_v47 = vpop.eup %2424  ;;  %v2364_v37 = vld [vmem:[#allocation9 + $0x70] ss:$8 sps:$4 sm:$0xff]   ;;  %2107 = vmatprep.subr.bf16.mxu0 %v2362_v31  ;;  %v1620_v31 = vrot.slane %v1571_v28, %v2680_v25 }
 0x594   :  { %v1209_v40 = vmul.f32 %v2425_v47, %v1201_v43  ;;  %v1208_v48 = vmul.f32 %v2425_v47, %v1200_v42  ;;  %v1237_v50 = vadd.f32 %v1233_v41, %v1222_v44  ;;  %v1236_v38 = vadd.f32 %v1229_v0, %v1221_v39  ;;  %2108 = vmatpush3.bf16.msra.mxu0 %v2364_v37  ;;  %v2370_v42 = vld [vmem:[#allocation9 + $0xd0] ss:$8 sps:$4 sm:$0xff]   ;;  %v2374_v44 = vld [vmem:[#allocation9 + $0xc0] ss:$8 sps:$4 sm:$0xff]  }
 0x595   :  { %v2372_v43 = vld [vmem:[#allocation9 + $0x50] ss:$8 sps:$4 sm:$0xff]   ;;  %v2376_v39 = vld [vmem:[#allocation9 + $0x40] ss:$8 sps:$4 sm:$0xff]  }
 0x596   :  { %v1224_v49 = vmul.f32 %v1218_v35, %v1209_v40  ;;  %v1223_v33 = vmul.f32 %v1214_v34, %v1208_v48  ;;  %v1241_v53 = vmax.f32 %v1237_v50, 0.0  ;;  %v1240_v55 = vmax.f32 %v1236_v38, 0.0  ;;  %v2378_v47 = vld [vmem:[#allocation9 + $0xb0] ss:$8 sps:$4 sm:$0xff]   ;;  %v2382_v48 = vld [vmem:[#allocation9 + $0xa0] ss:$8 sps:$4 sm:$0xff]  }
 0x597   :  { %v1259_v34 = vmul.f32 %v2828_v24, %v2828_v24  ;;  %v1258_v35 = vmul.f32 %v2834_v10, %v2834_v10  ;;  %v2380_v40 = vld [vmem:[#allocation9 + $0x30] ss:$8 sps:$4 sm:$0xff]   ;;  %v2390_v38 = vld [vmem:[#allocation9 + $0x80] ss:$8 sps:$4 sm:$0xff]  }
 0x598   :  { %v1239_v51 = vadd.f32 %v1233_v41, %v1224_v49  ;;  %v1238_v52 = vadd.f32 %v1229_v0, %v1223_v33  ;;  %v2366_v0 = vld [vmem:[#allocation9 + $0xe0] ss:$8 sps:$4 sm:$0xff]   ;;  %v2386_v50 = vld [vmem:[#allocation9 + $0x90] ss:$8 sps:$4 sm:$0xff]  }
 0x599   :  { %v1263_v36 = vadd.f32 %v1259_v34, %v1258_v35  ;;  %v2368_v41 = vld [vmem:[#allocation9 + $0x60] ss:$8 sps:$4 sm:$0xff]   ;;  %2109 = vmatprep.subr.bf16.mxu0 %v2366_v0  ;;  %v2388_v33 = vld [vmem:[#allocation9 + $0x10] ss:$8 sps:$4 sm:$0xff]  }
 0x59a   :  { %v1243_v54 = vmax.f32 %v1239_v51, 0.0  ;;  %v1242_v56 = vmax.f32 %v1238_v52, 0.0  ;;  %2110 = vmatpush3.bf16.msra.mxu0 %v2368_v41  ;;  %v2384_v49 = vld [vmem:[#allocation9 + $0x20] ss:$8 sps:$4 sm:$0xff]   ;;  %v2394_v52 = vld [vmem:[#allocation9 + $0xf4] ss:$8 sps:$4 sm:$0xff]  }
 0x59b   :  { %2111 = vmatprep.subr.bf16.mxu0 %v2370_v42  ;;  %v2392_v51 = vld [vmem:[#allocation9] ss:$8 sps:$4 sm:$0xff]  }
 0x59c   :  { %v1321_v57 = vpack.c.bf16 %v1243_v54, %v1241_v53  ;;  %v1320_v58 = vpack.c.bf16 %v1242_v56, %v1240_v55 }
 0x59e   :  { %1559 = vmatprep.mubr.bf16.mxu1 %v1321_v57  ;;  %2112 = vmatpush3.bf16.msra.mxu0 %v2372_v43 }
 0x59f   :  { %1560 = vmatmul.mubr.bf16.vlgmr.msra.gmra.mxu1 %v1320_v58  ;;  %2113 = vmatprep.subr.bf16.mxu0 %v2374_v44 }
 0x5a2   :  { %2114 = vmatpush3.bf16.msra.mxu0 %v2376_v39 }
 0x5a3   :  { %2115 = vmatprep.subr.bf16.mxu0 %v2378_v47 }
 0x5a6   :  { %2116 = vmatpush3.bf16.msra.mxu0 %v2380_v40 }
 0x5a7   :  { %2117 = vmatprep.subr.bf16.mxu0 %v2382_v48 }
 0x5aa   :  { %2118 = vmatpush3.bf16.msra.mxu0 %v2384_v49 }
 0x5ab   :  { %2119 = vmatprep.subr.bf16.mxu0 %v2386_v50 }
 0x5ae   :  { %2120 = vmatpush3.bf16.msra.mxu0 %v2388_v33 }
 0x5af   :  { %2121 = vmatprep.subr.bf16.mxu0 %v2390_v38 }
 0x5b2   :  { %2122 = vmatpush3.bf16.msra.mxu0 %v2392_v51 }
 0x5b3   :  { %2129 = vmatprep.subr.bf16.mxu0 %v2394_v52 }
 0x65f   :  { %v1561_v61 = vpop.f32.mrf.mxu1 }
 0x660   :  { %v2802_v5 = vadd.f32 %v1561_v61, %v1360_v59 }
 0x661   :  { %v1563_v1 = vpop.f32.mrf.mxu1 }
 0x662   :  { %v2804_v6 = vadd.f32 %v1563_v1, %v1364_v60  ;;  %v1582_v15 = vmul.f32 %v2802_v5, %v2802_v5 }
 0x663   :  { %v1565_v7 = vpop.f32.mrf.mxu1 }
 0x664   :  { %v1574_v3 = vadd.f32 %v2804_v6, %v2802_v5  ;;  %v1583_v11 = vmul.f32 %v2804_v6, %v2804_v6  ;;  %v2812_v14 = vadd.f32 %v1565_v7, %v1360_v59 }
 0x665   :  { %v1567_v12 = vpop.f32.mrf.mxu1 }
 0x666   :  { %v2814_v22 = vadd.f32 %v1567_v12, %v1364_v60  ;;  %1575 = vadd.xlane.f32.xlu0 %v1574_v3  ;;  %v1586_v18 = vadd.f32 %v1583_v11, %v1582_v15  ;;  %v1584_v29 = vmul.f32 %v2812_v14, %v2812_v14 }
 0x668   :  { %v1577_v17 = vadd.f32 %v2814_v22, %v2812_v14  ;;  %v1585_v19 = vmul.f32 %v2814_v22, %v2814_v22 }
 0x66a   :  { %1578 = vadd.xlane.f32.xlu1 %v1577_v17  ;;  %1587 = vadd.xlane.f32.xlu0 %v1586_v18  ;;  %v1589_v26 = vadd.f32 %v1585_v19, %v1584_v29 }
 0x66e   :  { %1590 = vadd.xlane.f32.xlu1 %v1589_v26  ;;  %1249 = vadd.xlane.f32.xlu0 %v1248_v27 }
 0x672   :  { %1252 = vadd.xlane.f32.xlu1 %v1251_v30  ;;  %1261 = vadd.xlane.f32.xlu0 %v1260_v32  ;;  %v1616_v32 = vrot.slane %v1571_v28, %v2677_v23  ;;  %v2404_v28 = vld [vmem:[#allocation9 + $0xa4] ss:$8 sps:$4 sm:$0xff]  }
 0x676   :  { %1264 = vadd.xlane.f32.xlu1 %v1263_v36  ;;  %v1573_v36 = vld [vmem:[#allocation10 + $0x26] ss:$8 sm:$0x3] }
 0x677   :  { %v1631_v42 = vrot.slane %v1573_v36, %v2677_v23  ;;  %v1635_v43 = vrot.slane %v1573_v36, %v2680_v25  ;;  %v2406_v36 = vld [vmem:[#allocation9 + $0x94] ss:$8 sps:$4 sm:$0xff]  }
 0x6ef   :  { %v1576_v53 = vpop.xlane.xlu0 %1575 }
 0x6f0   :  { %v1580_v54 = vmul.f32 0.00390625, %v1576_v53 }
 0x6f2   :  { %v1594_v58 = vmul.f32 %v1580_v54, %v1580_v54  ;;  %v1600_v34 = vsub.f32 %v2802_v5, %v1580_v54  ;;  %v1601_v35 = vsub.f32 %v2804_v6, %v1580_v54  ;;  %v1245_v5 = vld [vmem:[#allocation10 + $0x22] ss:$8 sm:$0x3]  ;;  %v1247_v54 = vld [vmem:[#allocation10 + $0x23] ss:$8 sm:$0x3] }
 0x6f3   :  { %v1579_v55 = vpop.xlane.xlu1 %1578  ;;  %v1588_v56 = vpop.xlane.xlu0 %1587  ;;  %v1294_v33 = vrot.slane %v1245_v5, %v2680_v25 }
 0x6f4   :  { %v1581_v57 = vmul.f32 0.00390625, %v1579_v55  ;;  %v1592_v45 = vmul.f32 0.00390625, %v1588_v56 }
 0x6f6   :  { %v1596_v46 = vsub.f32 %v1592_v45, %v1594_v58  ;;  %v1595_v62 = vmul.f32 %v1581_v57, %v1581_v57  ;;  %v1602_v44 = vsub.f32 %v2812_v14, %v1581_v57  ;;  %v1603_v39 = vsub.f32 %v2814_v22, %v1581_v57 }
 0x6f7   :  { %v1591_v59 = vpop.xlane.xlu1 %1590  ;;  %v1250_v60 = vpop.xlane.xlu0 %1249  ;;  %v1309_v45 = vrot.slane %v1247_v54, %v2680_v25 }
 0x6f8   :  { %v1598_v61 = vmax.f32 %v1596_v46, 0.0  ;;  %v1593_v63 = vmul.f32 0.00390625, %v1591_v59  ;;  %v2844_v1 = vmul.f32 0.00390625, %v1250_v60 }
 0x6fa   :  { %v1604_v2 = vadd.f32 1e-05, %v1598_v61  ;;  %v1597_v7 = vsub.f32 %v1593_v63, %v1595_v62  ;;  %v1268_v3 = vmul.f32 %v2844_v1, %v2844_v1  ;;  %v1275_v38 = vsub.f32 %v2818_v16, %v2844_v1 }
 0x6fb   :  { %v1253_v8 = vpop.xlane.xlu1 %1252  ;;  %v1262_v11 = vpop.xlane.xlu0 %1261 }
 0x6fc   :  { %2426 = vrsqrt.f32 %v1604_v2  ;;  %v1599_v4 = vmax.f32 %v1597_v7, 0.0  ;;  %v2848_v12 = vmul.f32 0.00390625, %v1253_v8  ;;  %v1266_v13 = vmul.f32 0.00390625, %v1262_v11  ;;  %v2395_v2 = vld [vmem:[#allocation9 + $0x74] ss:$8 sps:$4 sm:$0xff]  }
 0x6fd   :  { %v2396_v8 = vld [vmem:[#allocation9 + $0xe4] ss:$8 sps:$4 sm:$0xff]  }
 0x6fe   :  { %v1605_v15 = vadd.f32 1e-05, %v1599_v4  ;;  %v1270_v17 = vsub.f32 %v1266_v13, %v1268_v3  ;;  %v1269_v20 = vmul.f32 %v2848_v12, %v2848_v12  ;;  %v1277_v57 = vsub.f32 %v2828_v24, %v2848_v12  ;;  %v2397_v4 = vld [vmem:[#allocation9 + $0x64] ss:$8 sps:$4 sm:$0xff]   ;;  %v2398_v13 = vld [vmem:[#allocation9 + $0xd4] ss:$8 sps:$4 sm:$0xff]  }
 0x6ff   :  { %v1265_v18 = vpop.xlane.xlu1 %1264 }
 0x700   :  { %2428 = vrsqrt.f32 %v1605_v15  ;;  %v1272_v19 = vmax.f32 %v1270_v17, 0.0  ;;  %v1267_v29 = vmul.f32 0.00390625, %v1265_v18  ;;  %v2399_v18 = vld [vmem:[#allocation9 + $0x54] ss:$8 sps:$4 sm:$0xff]  }
 0x702   :  { %v1278_v26 = vadd.f32 1e-05, %v1272_v19  ;;  %v1271_v27 = vsub.f32 %v1267_v29, %v1269_v20  ;;  %v2400_v19 = vld [vmem:[#allocation9 + $0xc4] ss:$8 sps:$4 sm:$0xff]   ;;  %v2402_v29 = vld [vmem:[#allocation9 + $0xb4] ss:$8 sps:$4 sm:$0xff]  }
 0x703   :  { %v2401_v20 = vld [vmem:[#allocation9 + $0x44] ss:$8 sps:$4 sm:$0xff]  }
 0x704   :  { %2430 = vrsqrt.f32 %v1278_v26  ;;  %v1273_v9 = vmax.f32 %v1271_v27, 0.0  ;;  %v1276_v26 = vsub.f32 %v2834_v10, %v2848_v12  ;;  %v2403_v27 = vld [vmem:[#allocation9 + $0x34] ss:$8 sps:$4 sm:$0xff]   ;;  %v2408_v12 = vld [vmem:[#allocation9 + $0x84] ss:$8 sps:$4 sm:$0xff]  }
 0x705   :  { %v2407_v10 = vld [vmem:[#allocation9 + $0x14] ss:$8 sps:$4 sm:$0xff]  }
 0x706   :  { %v1279_v30 = vadd.f32 1e-05, %v1273_v9  ;;  %v1274_v9 = vsub.f32 %v2824_v21, %v2844_v1  ;;  %v2409_v1 = vld [vmem:[#allocation9 + $0x4] ss:$8 sps:$4 sm:$0xff]  }
 0x708   :  { %2432 = vrsqrt.f32 %v1279_v30 }
 0x709   :  { %v2427_v37 = vpop.eup %2426 }
 0x70a   :  { %v1609_v0 = vmul.f32 %v2427_v37, %v1601_v35  ;;  %v1608_v41 = vmul.f32 %v2427_v37, %v1600_v34  ;;  %v2405_v35 = vld [vmem:[#allocation9 + $0x24] ss:$8 sps:$4 sm:$0xff]   ;;  %v1305_v37 = vrot.slane %v1247_v54, %v2677_v23 }
 0x70c   :  { %v1624_v47 = vmul.f32 %v1620_v31, %v1609_v0  ;;  %v1623_v40 = vmul.f32 %v1616_v32, %v1608_v41 }
 0x70d   :  { %v2429_v48 = vpop.eup %2428 }
 0x70e   :  { %v1611_v6 = vmul.f32 %v2429_v48, %v1603_v39  ;;  %v1610_v49 = vmul.f32 %v2429_v48, %v1602_v44  ;;  %v1639_v50 = vadd.f32 %v1635_v43, %v1624_v47  ;;  %v1638_v53 = vadd.f32 %v1631_v42, %v1623_v40  ;;  %v1680_v47 = vld [vmem:[#allocation10 + $0x27] ss:$0 sm:$0xff] }
 0x710   :  { %v1626_v51 = vmul.f32 %v1620_v31, %v1611_v6  ;;  %v1625_v52 = vmul.f32 %v1616_v32, %v1610_v49  ;;  %v1643_v58 = vmax.f32 %v1639_v50, 0.0  ;;  %v1642_v59 = vmax.f32 %v1638_v53, 0.0 }
 0x711   :  { %v2431_v55 = vpop.eup %2430  ;;  %v1290_v32 = vrot.slane %v1245_v5, %v2677_v23 }
 0x712   :  { %v1641_v14 = vadd.f32 %v1635_v43, %v1626_v51  ;;  %v1640_v56 = vadd.f32 %v1631_v42, %v1625_v52  ;;  %v1283_v22 = vmul.f32 %v2431_v55, %v1275_v38  ;;  %v1282_v34 = vmul.f32 %v2431_v55, %v1274_v9  ;;  %v1820_v38 = vld [vmem:[#allocation10 + $0x40] ss:$0 sm:$0xff] }
 0x714   :  { %v1645_v46 = vmax.f32 %v1641_v14, 0.0  ;;  %v1644_v60 = vmax.f32 %v1640_v56, 0.0  ;;  %v1298_v61 = vmul.f32 %v1294_v33, %v1283_v22  ;;  %v1297_v0 = vmul.f32 %v1290_v32, %v1282_v34 }
 0x715   :  { %v2433_v62 = vpop.eup %2432 }
 0x716   :  { %v1679_v16 = vpack.c.bf16 %v1645_v46, %v1643_v58  ;;  %v1678_v63 = vpack.c.bf16 %v1644_v60, %v1642_v59  ;;  %v1285_v7 = vmul.f32 %v2433_v62, %v1277_v57  ;;  %v1313_v11 = vadd.f32 %v1309_v45, %v1298_v61 }
 0x717   :  { %v1284_v30 = vmul.f32 %v2433_v62, %v1276_v26  ;;  %v1312_v21 = vadd.f32 %v1305_v37, %v1297_v0 }
 0x718   :  { %1809 = vmatprep.mubr.bf16.mxu0 %v1679_v16  ;;  %v1300_v3 = vmul.f32 %v1294_v33, %v1285_v7  ;;  %v1317_v25 = vmax.f32 %v1313_v11, 0.0 }
 0x719   :  { %1810 = vmatmul.mubr.bf16.vlgmr.msra.gmra.mxu0 %v1678_v63  ;;  %v1299_v31 = vmul.f32 %v1290_v32, %v1284_v30  ;;  %v1316_v43 = vmax.f32 %v1312_v21, 0.0 }
 0x71a   :  { %2130 = vmatpush3.bf16.msra.mxu0 %v2395_v2  ;;  %v1315_v24 = vadd.f32 %v1309_v45, %v1300_v3 }
 0x71b   :  { %2131 = vmatprep.subr.bf16.mxu0 %v2396_v8  ;;  %v1314_v41 = vadd.f32 %v1305_v37, %v1299_v31 }
 0x71c   :  { %v1319_v15 = vmax.f32 %v1315_v24, 0.0 }
 0x71d   :  { %v1318_v42 = vmax.f32 %v1314_v41, 0.0 }
 0x71e   :  { %2132 = vmatpush3.bf16.msra.mxu0 %v2397_v4  ;;  %v1819_v17 = vpack.c.bf16 %v1319_v15, %v1317_v25 }
 0x71f   :  { %2133 = vmatprep.subr.bf16.mxu0 %v2398_v13  ;;  %v1818_v44 = vpack.c.bf16 %v1318_v42, %v1316_v43 }
 0x720   :  { %1917 = vmatprep.mubr.bf16.mxu0 %v1819_v17 }
 0x722   :  { %2134 = vmatpush3.bf16.msra.mxu0 %v2399_v18 }
 0x723   :  { %2135 = vmatprep.subr.bf16.mxu0 %v2400_v19 }
 0x726   :  { %2136 = vmatpush3.bf16.msra.mxu0 %v2401_v20 }
 0x727   :  { %2137 = vmatprep.subr.bf16.mxu0 %v2402_v29 }
 0x72a   :  { %2138 = vmatpush3.bf16.msra.mxu0 %v2403_v27 }
 0x72b   :  { %2139 = vmatprep.subr.bf16.mxu0 %v2404_v28 }
 0x72e   :  { %2140 = vmatpush3.bf16.msra.mxu0 %v2405_v35 }
 0x72f   :  { %2141 = vmatprep.subr.bf16.mxu0 %v2406_v36 }
 0x732   :  { %2142 = vmatpush3.bf16.msra.mxu0 %v2407_v10 }
 0x733   :  { %2143 = vmatprep.subr.bf16.mxu0 %v2408_v12 }
 0x736   :  { %2144 = vmatpush3.bf16.msra.mxu0 %v2409_v1 }
 0x739   :  { %1918 = vmatmul.mubr.bf16.vlgmr.msra.gmra.mxu0 %v1818_v44 }
 0x7d9   :  { %v2123_v39 = vpop.f32.mrf.mxu0 }
 0x7db   :  { %v2124_v40 = vpop.f32.mrf.mxu0 }
 0x7dc   :  { %v2125_v5 = vadd.f32 %v2124_v40, %v2123_v39 }
 0x7dd   :  { %v2126_v23 = vpop.f32.mrf.mxu0 }
 0x7de   :  { %v1812_v48 = vadd.f32 %v2125_v5, %v1680_v47 }
 0x7df   :  { %v2127_v6 = vpop.f32.mrf.mxu0 }
 0x7e0   :  { %1926 = vst [vmem:[%s2893_s9] sm:$0xff] %v1812_v48  ;;  %v2128_v49 = vadd.f32 %v2127_v6, %v2126_v23 }
 0x7e2   :  { %v1815_v50 = vadd.f32 %v2128_v49, %v1680_v47 }
 0x7e4   :  { %1927 = vst [vmem:[%s2893_s9 + $0x20] sm:$0xff] %v1815_v50 }
 0x7f9   :  { %v2145_v33 = vpop.f32.mrf.mxu0 }
 0x7fb   :  { %v2146_v51 = vpop.f32.mrf.mxu0 }
 0x7fc   :  { %v2147_v52 = vadd.f32 %v2146_v51, %v2145_v33 }
 0x7fd   :  { %v2148_v53 = vpop.f32.mrf.mxu0 }
 0x7fe   :  { %v1920_v54 = vadd.f32 %v2147_v52, %v1820_v38 }
 0x7ff   :  { %v2149_v55 = vpop.f32.mrf.mxu0 }
 0x800   :  { %1932 = vst [vmem:[%s2893_s9 + $0x18] sm:$0xff] %v1920_v54  ;;  %v2150_v14 = vadd.f32 %v2149_v55, %v2148_v53 }
 0x802   :  { %v1923_v56 = vadd.f32 %v2150_v14, %v1820_v38 }
 0x804   :  { %1933 = vst [vmem:[%s2893_s9 + $0x38] sm:$0xff] %v1923_v56 }
 0x805   :  { %1938 = vsyncpa [#allocation3], 1 }
 0x806   :  { %1939 = vsyncpa [#allocation5], 1 }
 0x807   :  { %1940 = vsyncpa [#allocation8], 1 }
 0x808   :  { %1941 = vsyncpa [#allocation11], 1 }

</bundles_post_ra>
